<compile_context>
chip_gen: v7x
topology: tpu7x:2x2x1
jax: 0.10.0
libtpu: 0.0.40
codegen_flags: <defaults>
</compile_context>

<pallas_src>
import functools

import jax
import jax.numpy as jnp
from jax.experimental import pallas as pl
from jax.experimental.pallas import tpu as pltpu

LANE = 128     # lane width (last dim alignment)
SUBLANE = 8    # sublane count (second-to-last dim alignment)


def _round_up(x, m):
    return (x + m - 1) // m * m


def _time_blocking(s, max_tb=16):
    """Pick (time_block, padded_S).  Guarantees tb >= min(8, s) so there is never a
    tb=1 per-grid-step-overhead cliff; if no divisor >= 8 exists, S is padded up to a
    multiple of max_tb (padded steps get exactly-zero `pre`, which is recurrence-exact)."""
    if s <= max_tb:
        return s, s
    for tb in range(max_tb, 7, -1):
        if s % tb == 0:
            return tb, s
    return max_tb, _round_up(s, max_tb)


def _row_tiling(n, max_tm=512):
    """Row tile for the parallel GEMM kernels: as large as possible but never padding
    N by more than ~12.5% (avoid nearly doubling work when N is just over a tile)."""
    tm = min(max_tm, _round_up(n, SUBLANE))
    while tm > 64 and (_round_up(n, tm) - n) * 8 > n:
        tm //= 2
    return tm, _round_up(n, tm)


# ----------------------------------------------------------------------------
# Pallas kernels
# ----------------------------------------------------------------------------
def _mlp_proj_kernel(x_ref, w1_ref, b1_ref, w2_ref, b2_ref, wp_ref, bp_ref, o_ref):
    """Fused layer-0 pipeline: relu(x@W1+b1) -> relu(.@W2+b2) -> .@Wih_cat + bias_cat.

    Produces `pre` for the layer-0 recurrence (both directions side by side when
    bidirectional).  All matmul operands are bf16, accumulation is f32; the MLP
    hidden is never written to HBM."""
    h = jnp.dot(x_ref[...], w1_ref[...], preferred_element_type=jnp.float32) + b1_ref[...]
    h = jnp.maximum(h, 0.0).astype(jnp.bfloat16)
    h = jnp.dot(h, w2_ref[...], preferred_element_type=jnp.float32) + b2_ref[...]
    h = jnp.maximum(h, 0.0).astype(jnp.bfloat16)
    o_ref[...] = (jnp.dot(h, wp_ref[...], preferred_element_type=jnp.float32)
                  + bp_ref[...]).astype(o_ref.dtype)


def _proj_pair_kernel(xf_ref, xb_ref, w_ref, b_ref, o_ref):
    """Layer>0 (bidir) input projection with no HBM concat:
    pre_cat = [out_f | out_b] @ W_cat + bias_cat  (one dense (2H,2H) GEMM)."""
    x = jnp.concatenate([xf_ref[...], xb_ref[...]], axis=-1).astype(jnp.bfloat16)
    o_ref[...] = (jnp.dot(x, w_ref[...], preferred_element_type=jnp.float32)
                  + b_ref[...]).astype(o_ref.dtype)


def _proj_single_kernel(x_ref, w_ref, b_ref, o_ref):
    """Layer>0 (unidirectional) input projection."""
    x = x_ref[...].astype(jnp.bfloat16)
    o_ref[...] = (jnp.dot(x, w_ref[...], preferred_element_type=jnp.float32)
                  + b_ref[...]).astype(o_ref.dtype)


def _rnn_bidir_kernel(pf_ref, pb_ref, whh_ref, of_ref, ob_ref, h_scr):
    """Recurrence-only kernel; both directions fused into ONE block-diagonal GEMM per
    timestep.  pf block = `pre` lanes [0:H] of original-time block t; pb block = `pre`
    lanes [H:2H] of original-time block (nT-1-t) (reversed index_map), processed
    back-to-front inside the kernel.  h_scr carries the concatenated [h_f | h_b]."""
    t = pl.program_id(0)

    @pl.when(t == 0)
    def _():
        h_scr[...] = jnp.zeros_like(h_scr)

    tb = pf_ref.shape[0]
    hp = pf_ref.shape[2]
    whh = whh_ref[...]            # (2H, 2H) bf16 block-diag; small enough to stay in vregs

    def step(j, h):
        jj = tb - 1 - j           # backward direction walks the block back-to-front
        pre = jnp.concatenate([pf_ref[j], pb_ref[jj]], axis=-1)      # (B_pad, 2H) f32
        h = jnp.tanh(pre + jnp.dot(h.astype(jnp.bfloat16), whh,
                                   preferred_element_type=jnp.float32))
        of_ref[j] = h[:, :hp]
        ob_ref[jj] = h[:, hp:]
        return h

    h_scr[...] = jax.lax.fori_loop(0, tb, step, h_scr[...], unroll=True)


def _rnn_uni_kernel(p_ref, whh_ref, o_ref, h_scr):
    t = pl.program_id(0)

    @pl.when(t == 0)
    def _():
        h_scr[...] = jnp.zeros_like(h_scr)

    tb = p_ref.shape[0]
    whh = whh_ref[...]

    def step(j, h):
        h = jnp.tanh(p_ref[j] + jnp.dot(h.astype(jnp.bfloat16), whh,
                                        preferred_element_type=jnp.float32))
        o_ref[j] = h
        return h

    h_scr[...] = jax.lax.fori_loop(0, tb, step, h_scr[...], unroll=True)


# ----------------------------------------------------------------------------
# pallas_call wrappers
# ----------------------------------------------------------------------------
def mlp_proj_forward(x2d, w1, b1, w2, b2, wp, bpj):
    """x2d: (N, D_pad) bf16 rows.  Returns pre: (N, width) f32."""
    n, d_in = x2d.shape
    width = wp.shape[1]
    tm, n_pad = _row_tiling(n)
    if n_pad != n:
        x2d = jnp.pad(x2d, ((0, n_pad - n), (0, 0)))
    out = pl.pallas_call(
        _mlp_proj_kernel,
        out_shape=jax.ShapeDtypeStruct((n_pad, width), jnp.float32),
        grid=(n_pad // tm,),
        in_specs=[
            pl.BlockSpec((tm, d_in), lambda i: (i, 0)),
            pl.BlockSpec(w1.shape, lambda i: (0, 0)),
            pl.BlockSpec(b1.shape, lambda i: (0, 0)),
            pl.BlockSpec(w2.shape, lambda i: (0, 0)),
            pl.BlockSpec(b2.shape, lambda i: (0, 0)),
            pl.BlockSpec(wp.shape, lambda i: (0, 0)),
            pl.BlockSpec(bpj.shape, lambda i: (0, 0)),
        ],
        out_specs=pl.BlockSpec((tm, width), lambda i: (i, 0)),
        compiler_params=pltpu.CompilerParams(dimension_semantics=("parallel",)),
    )(x2d, w1, b1, w2, b2, wp, bpj)
    return out[:n] if n_pad != n else out


def proj_pair_forward(xf2d, xb2d, w_cat, b_cat):
    n, hp = xf2d.shape
    width = w_cat.shape[1]
    tm, n_pad = _row_tiling(n)
    if n_pad != n:
        xf2d = jnp.pad(xf2d, ((0, n_pad - n), (0, 0)))
        xb2d = jnp.pad(xb2d, ((0, n_pad - n), (0, 0)))
    out = pl.pallas_call(
        _proj_pair_kernel,
        out_shape=jax.ShapeDtypeStruct((n_pad, width), jnp.float32),
        grid=(n_pad // tm,),
        in_specs=[
            pl.BlockSpec((tm, hp), lambda i: (i, 0)),
            pl.BlockSpec((tm, hp), lambda i: (i, 0)),
            pl.BlockSpec(w_cat.shape, lambda i: (0, 0)),
            pl.BlockSpec(b_cat.shape, lambda i: (0, 0)),
        ],
        out_specs=pl.BlockSpec((tm, width), lambda i: (i, 0)),
        compiler_params=pltpu.CompilerParams(dimension_semantics=("parallel",)),
    )(xf2d, xb2d, w_cat, b_cat)
    return out[:n] if n_pad != n else out


def proj_single_forward(x2d, w, b):
    n, hp = x2d.shape
    width = w.shape[1]
    tm, n_pad = _row_tiling(n)
    if n_pad != n:
        x2d = jnp.pad(x2d, ((0, n_pad - n), (0, 0)))
    out = pl.pallas_call(
        _proj_single_kernel,
        out_shape=jax.ShapeDtypeStruct((n_pad, width), jnp.float32),
        grid=(n_pad // tm,),
        in_specs=[
            pl.BlockSpec((tm, hp), lambda i: (i, 0)),
            pl.BlockSpec(w.shape, lambda i: (0, 0)),
            pl.BlockSpec(b.shape, lambda i: (0, 0)),
        ],
        out_specs=pl.BlockSpec((tm, width), lambda i: (i, 0)),
        compiler_params=pltpu.CompilerParams(dimension_semantics=("parallel",)),
    )(x2d, w, b)
    return out[:n] if n_pad != n else out


def rnn_bidir(pre_cat, whh_cat, *, tb):
    """pre_cat: (S_pad, B_pad, 2*H_pad) f32 = [pre_f | pre_b] along lanes.
    Returns (out_f, out_b), each (S_pad, B_pad, H_pad) in ORIGINAL time order."""
    s_pad, bp, width = pre_cat.shape
    hp = width // 2
    nt = s_pad // tb
    return pl.pallas_call(
        _rnn_bidir_kernel,
        out_shape=(jax.ShapeDtypeStruct((s_pad, bp, hp), jnp.float32),
                   jax.ShapeDtypeStruct((s_pad, bp, hp), jnp.float32)),
        grid=(nt,),
        in_specs=[
            pl.BlockSpec((tb, bp, hp), lambda t: (t, 0, 0)),            # fwd pre (lanes 0:H)
            pl.BlockSpec((tb, bp, hp), lambda t: (nt - 1 - t, 0, 1)),   # bwd pre (lanes H:2H, reversed)
            pl.BlockSpec((2 * hp, 2 * hp), lambda t: (0, 0)),
        ],
        out_specs=(
            pl.BlockSpec((tb, bp, hp), lambda t: (t, 0, 0)),
            pl.BlockSpec((tb, bp, hp), lambda t: (nt - 1 - t, 0, 0)),
        ),
        scratch_shapes=[pltpu.VMEM((bp, 2 * hp), jnp.float32)],
        compiler_params=pltpu.CompilerParams(dimension_semantics=("arbitrary",)),
    )(pre_cat, pre_cat, whh_cat)


def rnn_uni(pre, whh, *, tb):
    s_pad, bp, hp = pre.shape
    nt = s_pad // tb
    return pl.pallas_call(
        _rnn_uni_kernel,
        out_shape=jax.ShapeDtypeStruct((s_pad, bp, hp), jnp.float32),
        grid=(nt,),
        in_specs=[
            pl.BlockSpec((tb, bp, hp), lambda t: (t, 0, 0)),
            pl.BlockSpec((hp, hp), lambda t: (0, 0)),
        ],
        out_specs=pl.BlockSpec((tb, bp, hp), lambda t: (t, 0, 0)),
        scratch_shapes=[pltpu.VMEM((bp, hp), jnp.float32)],
        compiler_params=pltpu.CompilerParams(dimension_semantics=("arbitrary",)),
    )(pre, whh)


# ----------------------------------------------------------------------------
# Parameter init (torch layout) and one-time packing (padded / transposed / bf16)
# ----------------------------------------------------------------------------
def init_params(key, n_vocab, d_emb, d_hid, n_layer, is_bidir):
    keys = jax.random.split(key, 64)
    ki = iter(range(64))

    def unif(k, shape, scale):
        return jax.random.uniform(k, shape, jnp.float32, -scale, scale)

    params = {}
    emb = unif(keys[next(ki)], (n_vocab, d_emb), 1.0)
    emb = emb.at[0].set(0.0)  # padding_idx=0
    params["emb"] = emb

    s1 = 1.0 / (d_emb ** 0.5)
    s2 = 1.0 / (d_hid ** 0.5)
    params["w1"] = unif(keys[next(ki)], (d_hid, d_emb), s1)   # torch Linear: (out, in)
    params["b1"] = unif(keys[next(ki)], (d_hid,), s1)
    params["w2"] = unif(keys[next(ki)], (d_hid, d_hid), s2)
    params["b2"] = unif(keys[next(ki)], (d_hid,), s2)

    n_dir = 2 if is_bidir else 1
    rnn = {}
    for layer in range(n_layer):
        in_sz = d_hid if layer == 0 else d_hid * n_dir
        for d in range(n_dir):
            rnn[(layer, d)] = dict(
                wih=unif(keys[next(ki)], (d_hid, in_sz), s2),
                whh=unif(keys[next(ki)], (d_hid, d_hid), s2),
                bih=unif(keys[next(ki)], (d_hid,), s2),
                bhh=unif(keys[next(ki)], (d_hid,), s2),
            )
    params["rnn"] = rnn
    return params


def pack_params(params, n_layer, is_bidir):
    """Pre-transpose / zero-pad / bf16-cast all weights ONCE (outside the jit hot path).

    * Matmul operand tensors (embedding table, W1/W2, Wih, Whh) are stored bf16;
      biases stay f32 and are added after f32 MXU accumulation.
    * Padded weight rows/cols and bias pads are zero, so padded lanes of the state
      stay exactly 0 through the tanh recurrence.
    * Bidirectional: Wih of both directions is packed side-by-side (columns), the
      recurrent Whh as a block-diagonal (2H, 2H), and bih+bhh is pre-folded.
    """
    d_hid, d_emb = params["w1"].shape
    d_pad = _round_up(d_emb, LANE)
    h_pad = _round_up(d_hid, LANE)
    n_dir = 2 if is_bidir else 1
    bf = jnp.bfloat16

    def pad2(a, shape, dtype=jnp.float32):
        out = jnp.zeros(shape, jnp.float32)
        out = out.at[:a.shape[0], :a.shape[1]].set(a)
        return out.astype(dtype)

    packed = {
        "emb": pad2(params["emb"], (params["emb"].shape[0], d_pad), bf),
        "w1_t": pad2(params["w1"].T, (d_pad, h_pad), bf),
        "b1": pad2(params["b1"].reshape(1, -1), (1, h_pad)),
        "w2_t": pad2(params["w2"].T, (h_pad, h_pad), bf),
        "b2": pad2(params["b2"].reshape(1, -1), (1, h_pad)),
    }

    rnn = []
    for layer in range(n_layer):
        dirs = [params["rnn"][(layer, d)] for d in range(n_dir)]
        if n_dir == 1:
            p = dirs[0]
            w_in = jnp.zeros((h_pad, h_pad), jnp.float32)
            w_in = w_in.at[:p["wih"].shape[1], :d_hid].set(p["wih"].T)
            entry = {
                "w_in": w_in.astype(bf),
                "b_in": pad2((p["bih"] + p["bhh"]).reshape(1, -1), (1, h_pad)),
                "whh": pad2(p["whh"].T, (h_pad, h_pad), bf),
            }
        else:
            in_rows = h_pad if layer == 0 else 2 * h_pad
            w_in = jnp.zeros((in_rows, 2 * h_pad), jnp.float32)
            b_in = jnp.zeros((1, 2 * h_pad), jnp.float32)
            whh = jnp.zeros((2 * h_pad, 2 * h_pad), jnp.float32)
            for d, p in enumerate(dirs):
                col = d * h_pad
                if layer == 0:
                    w_in = w_in.at[:d_hid, col:col + d_hid].set(p["wih"].T)
                else:
                    # layer>0 input = [out_fwd_padded | out_bwd_padded]
                    w_in = w_in.at[:d_hid, col:col + d_hid].set(p["wih"][:, :d_hid].T)
                    w_in = w_in.at[h_pad:h_pad + d_hid, col:col + d_hid].set(
                        p["wih"][:, d_hid:].T)
                b_in = b_in.at[0, col:col + d_hid].set(p["bih"] + p["bhh"])
                whh = whh.at[col:col + d_hid, col:col + d_hid].set(p["whh"].T)
            entry = {"w_in": w_in.astype(bf), "b_in": b_in, "whh": whh.astype(bf)}
        rnn.append(entry)
    packed["rnn"] = rnn
    return packed


# ----------------------------------------------------------------------------
# Model forward (glue in plain JAX, hot paths in Pallas)
# ----------------------------------------------------------------------------
@functools.partial(jax.jit, static_argnames=("n_layer", "is_bidir", "d_hid"))
def attn_rnn_enc_forward(packed, src, src_len, *, n_layer, is_bidir, d_hid):
    """src: (B, S) int32; src_len: (B,) int32.

    Returns (last, out): last (B, H*ndir) = out[arange(B), src_len-1],
                         out  (B, S, H*ndir).
    """
    b, s = src.shape
    b_pad = _round_up(b, SUBLANE)
    h_pad = packed["w1_t"].shape[1]
    n_dir = 2 if is_bidir else 1
    width = n_dir * h_pad
    tb, s_pad = _time_blocking(s)

    # Embedding gather directly in time-major order (transpose the int ids, never the
    # embedded tensor).  Row 0 of the (bf16) table is zero (padding_idx=0).
    # TODO(synk): the data-dependent row gather stays in XLA (jnp.take).
    x = jnp.take(packed["emb"], src.T, axis=0)            # (S, B, D_pad) bf16
    if b_pad != b:
        x = jnp.pad(x, ((0, 0), (0, b_pad - b), (0, 0)))
    x2d = x.reshape(s * b_pad, -1)

    def to_time_blocks(pre2d):
        pre = pre2d.reshape(s, b_pad, width)
        if s_pad != s:
            # Zero-padded tail `pre` keeps the (backward) recurrence state exactly 0
            # through padded timesteps, so the padded recurrence is exact.
            pre = jnp.pad(pre, ((0, s_pad - s), (0, 0), (0, 0)))
        return pre

    # Layer 0: fused MLP + input projection(s).
    layer0 = packed["rnn"][0]
    pre = to_time_blocks(mlp_proj_forward(
        x2d, packed["w1_t"], packed["b1"], packed["w2_t"], packed["b2"],
        layer0["w_in"], layer0["b_in"]))

    out_f = out_b = None
    for layer in range(n_layer):
        lp = packed["rnn"][layer]
        if layer > 0:
            if is_bidir:
                pre = to_time_blocks(proj_pair_forward(
                    out_f[:s].reshape(s * b_pad, h_pad),
                    out_b[:s].reshape(s * b_pad, h_pad),
                    lp["w_in"], lp["b_in"]))
            else:
                pre = to_time_blocks(proj_single_forward(
                    out_f[:s].reshape(s * b_pad, h_pad), lp["w_in"], lp["b_in"]))
        if is_bidir:
            out_f, out_b = rnn_bidir(pre, lp["whh"], tb=tb)
        else:
            out_f = rnn_uni(pre, lp["whh"], tb=tb)

    # Epilogue.  NOTE: padded batch rows ([:, b:, :]) carry bias garbage by design and
    # are discarded here; never read them elsewhere.  `last` is gathered from the
    # time-major tensor before the big transpose.
    b_idx = jnp.arange(b)
    t_idx = src_len - 1
    if is_bidir:
        last = jnp.concatenate([out_f[t_idx, b_idx, :d_hid],
                                out_b[t_idx, b_idx, :d_hid]], axis=-1)
        out = jnp.concatenate([out_f[:s, :b, :d_hid], out_b[:s, :b, :d_hid]], axis=-1)
    else:
        last = out_f[t_idx, b_idx, :d_hid]
        out = out_f[:s, :b, :d_hid]
    out = jnp.transpose(out, (1, 0, 2))                   # (B, S, H*ndir)
    return last, out


# ----------------------------------------------------------------------------
# Pure-JAX f32 reference (sanity check against the bf16-MXU Pallas path)
# ----------------------------------------------------------------------------
def reference_forward(params, src, src_len, n_layer, is_bidir):
    b, s = src.shape
    d_hid = params["w1"].shape[0]
    emb = jnp.take(params["emb"], src, axis=0)
    h = jnp.maximum(emb @ params["w1"].T + params["b1"], 0.0)
    h = jnp.maximum(h @ params["w2"].T + params["b2"], 0.0)

    def run_dir(x_bsd, p):
        def step(hprev, x_t):
            hn = jnp.tanh(x_t @ p["wih"].T + hprev @ p["whh"].T + p["bih"] + p["bhh"])
            return hn, hn
        _, ys = jax.lax.scan(step, jnp.zeros((b, d_hid), jnp.float32),
                             jnp.transpose(x_bsd, (1, 0, 2)))
        return jnp.transpose(ys, (1, 0, 2))

    x = h
    n_dir = 2 if is_bidir else 1
    for layer in range(n_layer):
        outs = []
        for d in range(n_dir):
            p = params["rnn"][(layer, d)]
            xin = x if d == 0 else x[:, ::-1]
            o = run_dir(xin, p)
            if d == 1:
                o = o[:, ::-1]
            outs.append(o)
        x = outs[0] if n_dir == 1 else jnp.concatenate(outs, axis=-1)
    return x[jnp.arange(b), src_len - 1], x


# ----------------------------------------------------------------------------
if __name__ == "__main__":
    N_VOCAB, D_EMB, D_HID = 32, 16, 32
    ATOL = RTOL = 3e-2   # bf16 MXU operands vs. f32 reference

    key = jax.random.PRNGKey(0)
    kp, ks, kl, kp2, ks2, kl2 = jax.random.split(key, 6)

    def check(params, src, src_len, n_layer, is_bidir, tag):
        packed = pack_params(params, n_layer, is_bidir)
        last, out = attn_rnn_enc_forward(packed, src, src_len,
                                         n_layer=n_layer, is_bidir=is_bidir, d_hid=D_HID)
        jax.block_until_ready((last, out))
        last_r, out_r = reference_forward(params, src, src_len, n_layer, is_bidir)
        assert out.shape == out_r.shape and last.shape == last_r.shape, tag
        assert jnp.allclose(out, out_r, atol=ATOL, rtol=RTOL), tag
        assert jnp.allclose(last, last_r, atol=ATOL, rtol=RTOL), tag

    # --- bidirectional, 2 layers (main config) ---
    B, S = 2, 8
    src = jax.random.randint(ks, (B, S), 1, N_VOCAB, dtype=jnp.int32)
    src_len = jax.random.randint(kl, (B,), 1, S + 1, dtype=jnp.int32)
    params_bi = init_params(kp, N_VOCAB, D_EMB, D_HID, 2, True)
    check(params_bi, src, src_len, 2, True, "bidir_2layer")

    # --- unidirectional, 2 layers (exercises the uni RNN + single-projection path) ---
    params_uni = init_params(kp2, N_VOCAB, D_EMB, D_HID, 2, False)
    check(params_uni, src, src_len, 2, False, "uni_2layer")

    # --- bidirectional, ragged S (exercises zero-padded tail time block) ---
    B2, S2 = 2, 19
    src2 = jax.random.randint(ks2, (B2, S2), 1, N_VOCAB, dtype=jnp.int32)
    src_len2 = jax.random.randint(kl2, (B2,), 1, S2 + 1, dtype=jnp.int32)
    check(params_bi, src2, src_len2, 2, True, "bidir_2layer_ragged")

    print("KERNEL_OK")
</pallas_src>

<mosaic_0001>
module attributes {stable_mosaic.version = 11 : i64} {
  func.func @_proj_pair_kernel(%arg0: i32, %arg1: memref<64x128xf32, #tpu.memory_space<vmem>>, %arg2: memref<64x128xf32, #tpu.memory_space<vmem>>, %arg3: memref<256x256xbf16, #tpu.memory_space<vmem>>, %arg4: memref<1x256xf32, #tpu.memory_space<vmem>>, %arg5: memref<64x256xf32, #tpu.memory_space<vmem>>) attributes {dimension_semantics = [#tpu.dimension_semantics<parallel>], iteration_bounds = array<i64: 1>, scalar_prefetch = 0 : i64, scratch_operands = 0 : i64, tpu.core_type = #tpu.core_type<tc>, window_params = [{transform_indices = @transform_0, window_bounds = array<i64: 64, 128>}, {transform_indices = @transform_1, window_bounds = array<i64: 64, 128>}, {pipeline_mode = #tpu.pipeline_mode<synchronous>, transform_indices = @transform_2, window_bounds = array<i64: 256, 256>}, {pipeline_mode = #tpu.pipeline_mode<synchronous>, transform_indices = @transform_3, window_bounds = array<i64: 1, 256>}, {transform_indices = @transform_4, window_bounds = array<i64: 64, 256>}]} {
    %c0 = arith.constant 0 : index
    %c0_0 = arith.constant 0 : index
    %0 = vector.load %arg1[%c0, %c0_0] : memref<64x128xf32, #tpu.memory_space<vmem>>, vector<64x128xf32>
    %c0_1 = arith.constant 0 : index
    %c0_2 = arith.constant 0 : index
    %1 = vector.load %arg2[%c0_1, %c0_2] : memref<64x128xf32, #tpu.memory_space<vmem>>, vector<64x128xf32>
    %2 = tpu.concatenate %0, %1 in 1 : vector<64x128xf32>, vector<64x128xf32> -> vector<64x256xf32>
    %3 = arith.truncf %2 : vector<64x256xf32> to vector<64x256xbf16>
    %c0_3 = arith.constant 0 : index
    %c0_4 = arith.constant 0 : index
    %4 = vector.load %arg3[%c0_3, %c0_4] : memref<256x256xbf16, #tpu.memory_space<vmem>>, vector<256x256xbf16>
    %cst = arith.constant dense<0.000000e+00> : vector<64x256xf32>
    %5 = tpu.matmul %3, %4, %cst {dimension_numbers = #tpu.dot_dimension_numbers<[1], [0], [0], [1], [0, 0, 1, 1], [], []>} : vector<64x256xbf16>, vector<256x256xbf16>, vector<64x256xf32> -> vector<64x256xf32>
    %c0_5 = arith.constant 0 : index
    %c0_6 = arith.constant 0 : index
    %6 = vector.load %arg4[%c0_5, %c0_6] : memref<1x256xf32, #tpu.memory_space<vmem>>, vector<1x256xf32>
    %7 = vector.broadcast %6 : vector<1x256xf32> to vector<64x256xf32>
    %8 = arith.addf %5, %7 : vector<64x256xf32>
    %c0_7 = arith.constant 0 : index
    %c0_8 = arith.constant 0 : index
    %9 = vector.load %arg5[%c0_7, %c0_8] : memref<64x256xf32, #tpu.memory_space<vmem>>, vector<64x256xf32>
    tpu.vector_store %arg5[%c0_7, %c0_8], %8 {strides = array<i32>} : memref<64x256xf32, #tpu.memory_space<vmem>>, vector<64x256xf32>,
    return
  }
  func.func @transform_0(%arg0: i32) -> (i32, i32) {
    %c0_i32 = arith.constant 0 : i32
    %c0_i32_0 = arith.constant 0 : i32
    return %arg0, %c0_i32 : i32, i32
  }
  func.func @transform_1(%arg0: i32) -> (i32, i32) {
    %c0_i32 = arith.constant 0 : i32
    %c0_i32_0 = arith.constant 0 : i32
    return %arg0, %c0_i32 : i32, i32
  }
  func.func @transform_2(%arg0: i32) -> (i32, i32) {
    %c0_i32 = arith.constant 0 : i32
    %c0_i32_0 = arith.constant 0 : i32
    %c0_i32_1 = arith.constant 0 : i32
    return %c0_i32, %c0_i32_0 : i32, i32
  }
  func.func @transform_3(%arg0: i32) -> (i32, i32) {
    %c0_i32 = arith.constant 0 : i32
    %c0_i32_0 = arith.constant 0 : i32
    %c0_i32_1 = arith.constant 0 : i32
    return %c0_i32, %c0_i32_0 : i32, i32
  }
  func.func @transform_4(%arg0: i32) -> (i32, i32) {
    %c0_i32 = arith.constant 0 : i32
    %c0_i32_0 = arith.constant 0 : i32
    return %arg0, %c0_i32 : i32, i32
  }
}

module attributes {stable_mosaic.version = 11 : i64} {
  func.func @_mlp_proj_kernel(%arg0: i32, %arg1: memref<64x128xbf16, #tpu.memory_space<vmem>>, %arg2: memref<128x128xbf16, #tpu.memory_space<vmem>>, %arg3: memref<1x128xf32, #tpu.memory_space<vmem>>, %arg4: memref<128x128xbf16, #tpu.memory_space<vmem>>, %arg5: memref<1x128xf32, #tpu.memory_space<vmem>>, %arg6: memref<128x256xbf16, #tpu.memory_space<vmem>>, %arg7: memref<1x256xf32, #tpu.memory_space<vmem>>, %arg8: memref<64x256xf32, #tpu.memory_space<vmem>>) attributes {dimension_semantics = [#tpu.dimension_semantics<parallel>], iteration_bounds = array<i64: 1>, scalar_prefetch = 0 : i64, scratch_operands = 0 : i64, tpu.core_type = #tpu.core_type<tc>, window_params = [{transform_indices = @transform_0, window_bounds = array<i64: 64, 128>}, {pipeline_mode = #tpu.pipeline_mode<synchronous>, transform_indices = @transform_1, window_bounds = array<i64: 128, 128>}, {pipeline_mode = #tpu.pipeline_mode<synchronous>, transform_indices = @transform_2, window_bounds = array<i64: 1, 128>}, {pipeline_mode = #tpu.pipeline_mode<synchronous>, transform_indices = @transform_3, window_bounds = array<i64: 128, 128>}, {pipeline_mode = #tpu.pipeline_mode<synchronous>, transform_indices = @transform_4, window_bounds = array<i64: 1, 128>}, {pipeline_mode = #tpu.pipeline_mode<synchronous>, transform_indices = @transform_5, window_bounds = array<i64: 128, 256>}, {pipeline_mode = #tpu.pipeline_mode<synchronous>, transform_indices = @transform_6, window_bounds = array<i64: 1, 256>}, {transform_indices = @transform_7, window_bounds = array<i64: 64, 256>}]} {
    %c0 = arith.constant 0 : index
    %c0_0 = arith.constant 0 : index
    %0 = vector.load %arg1[%c0, %c0_0] : memref<64x128xbf16, #tpu.memory_space<vmem>>, vector<64x128xbf16>
    %c0_1 = arith.constant 0 : index
    %c0_2 = arith.constant 0 : index
    %1 = vector.load %arg2[%c0_1, %c0_2] : memref<128x128xbf16, #tpu.memory_space<vmem>>, vector<128x128xbf16>
    %cst = arith.constant dense<0.000000e+00> : vector<64x128xf32>
    %2 = tpu.matmul %0, %1, %cst {dimension_numbers = #tpu.dot_dimension_numbers<[1], [0], [0], [1], [0, 0, 1, 1], [], []>} : vector<64x128xbf16>, vector<128x128xbf16>, vector<64x128xf32> -> vector<64x128xf32>
    %c0_3 = arith.constant 0 : index
    %c0_4 = arith.constant 0 : index
    %3 = vector.load %arg3[%c0_3, %c0_4] : memref<1x128xf32, #tpu.memory_space<vmem>>, vector<1x128xf32>
    %4 = vector.broadcast %3 : vector<1x128xf32> to vector<64x128xf32>
    %5 = arith.addf %2, %4 : vector<64x128xf32>
    %cst_5 = arith.constant 0.000000e+00 : f32
    %6 = vector.broadcast %cst_5 : f32 to vector<64x128xf32>
    %7 = arith.maximumf %5, %6 : vector<64x128xf32>
    %8 = arith.truncf %7 : vector<64x128xf32> to vector<64x128xbf16>
    %c0_6 = arith.constant 0 : index
    %c0_7 = arith.constant 0 : index
    %9 = vector.load %arg4[%c0_6, %c0_7] : memref<128x128xbf16, #tpu.memory_space<vmem>>, vector<128x128xbf16>
    %cst_8 = arith.constant dense<0.000000e+00> : vector<64x128xf32>
    %10 = tpu.matmul %8, %9, %cst_8 {dimension_numbers = #tpu.dot_dimension_numbers<[1], [0], [0], [1], [0, 0, 1, 1], [], []>} : vector<64x128xbf16>, vector<128x128xbf16>, vector<64x128xf32> -> vector<64x128xf32>
    %c0_9 = arith.constant 0 : index
    %c0_10 = arith.constant 0 : index
    %11 = vector.load %arg5[%c0_9, %c0_10] : memref<1x128xf32, #tpu.memory_space<vmem>>, vector<1x128xf32>
    %12 = vector.broadcast %11 : vector<1x128xf32> to vector<64x128xf32>
    %13 = arith.addf %10, %12 : vector<64x128xf32>
    %cst_11 = arith.constant 0.000000e+00 : f32
    %14 = vector.broadcast %cst_11 : f32 to vector<64x128xf32>
    %15 = arith.maximumf %13, %14 : vector<64x128xf32>
    %16 = arith.truncf %15 : vector<64x128xf32> to vector<64x128xbf16>
    %c0_12 = arith.constant 0 : index
    %c0_13 = arith.constant 0 : index
    %17 = vector.load %arg6[%c0_12, %c0_13] : memref<128x256xbf16, #tpu.memory_space<vmem>>, vector<128x256xbf16>
    %cst_14 = arith.constant dense<0.000000e+00> : vector<64x256xf32>
    %18 = tpu.matmul %16, %17, %cst_14 {dimension_numbers = #tpu.dot_dimension_numbers<[1], [0], [0], [1], [0, 0, 1, 1], [], []>} : vector<64x128xbf16>, vector<128x256xbf16>, vector<64x256xf32> -> vector<64x256xf32>
    %c0_15 = arith.constant 0 : index
    %c0_16 = arith.constant 0 : index
    %19 = vector.load %arg7[%c0_15, %c0_16] : memref<1x256xf32, #tpu.memory_space<vmem>>, vector<1x256xf32>
    %20 = vector.broadcast %19 : vector<1x256xf32> to vector<64x256xf32>
    %21 = arith.addf %18, %20 : vector<64x256xf32>
    %c0_17 = arith.constant 0 : index
    %c0_18 = arith.constant 0 : index
    %22 = vector.load %arg8[%c0_17, %c0_18] : memref<64x256xf32, #tpu.memory_space<vmem>>, vector<64x256xf32>
    tpu.vector_store %arg8[%c0_17, %c0_18], %21 {strides = array<i32>} : memref<64x256xf32, #tpu.memory_space<vmem>>, vector<64x256xf32>,
    return
  }
  func.func @transform_0(%arg0: i32) -> (i32, i32) {
    %c0_i32 = arith.constant 0 : i32
    %c0_i32_0 = arith.constant 0 : i32
    return %arg0, %c0_i32 : i32, i32
  }
  func.func @transform_1(%arg0: i32) -> (i32, i32) {
    %c0_i32 = arith.constant 0 : i32
    %c0_i32_0 = arith.constant 0 : i32
    %c0_i32_1 = arith.constant 0 : i32
    return %c0_i32, %c0_i32_0 : i32, i32
  }
  func.func @transform_2(%arg0: i32) -> (i32, i32) {
    %c0_i32 = arith.constant 0 : i32
    %c0_i32_0 = arith.constant 0 : i32
    %c0_i32_1 = arith.constant 0 : i32
    return %c0_i32, %c0_i32_0 : i32, i32
  }
  func.func @transform_3(%arg0: i32) -> (i32, i32) {
    %c0_i32 = arith.constant 0 : i32
    %c0_i32_0 = arith.constant 0 : i32
    %c0_i32_1 = arith.constant 0 : i32
    return %c0_i32, %c0_i32_0 : i32, i32
  }
  func.func @transform_4(%arg0: i32) -> (i32, i32) {
    %c0_i32 = arith.constant 0 : i32
    %c0_i32_0 = arith.constant 0 : i32
    %c0_i32_1 = arith.constant 0 : i32
    return %c0_i32, %c0_i32_0 : i32, i32
  }
  func.func @transform_5(%arg0: i32) -> (i32, i32) {
    %c0_i32 = arith.constant 0 : i32
    %c0_i32_0 = arith.constant 0 : i32
    %c0_i32_1 = arith.constant 0 : i32
    return %c0_i32, %c0_i32_0 : i32, i32
  }
  func.func @transform_6(%arg0: i32) -> (i32, i32) {
    %c0_i32 = arith.constant 0 : i32
    %c0_i32_0 = arith.constant 0 : i32
    %c0_i32_1 = arith.constant 0 : i32
    return %c0_i32, %c0_i32_0 : i32, i32
  }
  func.func @transform_7(%arg0: i32) -> (i32, i32) {
    %c0_i32 = arith.constant 0 : i32
    %c0_i32_0 = arith.constant 0 : i32
    return %arg0, %c0_i32 : i32, i32
  }
}

module attributes {stable_mosaic.version = 11 : i64} {
  func.func @_rnn_bidir_kernel(%arg0: i32, %arg1: memref<8x8x128xf32, #tpu.memory_space<vmem>>, %arg2: memref<8x8x128xf32, #tpu.memory_space<vmem>>, %arg3: memref<256x256xbf16, #tpu.memory_space<vmem>>, %arg4: memref<8x8x128xf32, #tpu.memory_space<vmem>>, %arg5: memref<8x8x128xf32, #tpu.memory_space<vmem>>, %arg6: memref<8x256xf32, #tpu.memory_space<vmem>>) attributes {dimension_semantics = [#tpu.dimension_semantics<arbitrary>], iteration_bounds = array<i64: 1>, scalar_prefetch = 0 : i64, scratch_operands = 1 : i64, tpu.core_type = #tpu.core_type<tc>, window_params = [{transform_indices = @transform_0, window_bounds = array<i64: 8, 8, 128>}, {transform_indices = @transform_1, window_bounds = array<i64: 8, 8, 128>}, {pipeline_mode = #tpu.pipeline_mode<synchronous>, transform_indices = @transform_2, window_bounds = array<i64: 256, 256>}, {transform_indices = @transform_3, window_bounds = array<i64: 8, 8, 128>}, {transform_indices = @transform_4, window_bounds = array<i64: 8, 8, 128>}]} {
    %c0_i32 = arith.constant 0 : i32
    %0 = arith.cmpi eq, %arg0, %c0_i32 : i32
    %1 = arith.extui %0 : i1 to i32
    %c0_i32_0 = arith.constant 0 : i32
    %2 = arith.cmpi ne, %1, %c0_i32_0 : i32
    scf.if %2 {
      %cst_86 = arith.constant 0.000000e+00 : f32
      %182 = vector.broadcast %cst_86 : f32 to vector<8x256xf32>
      %c0_87 = arith.constant 0 : index
      %c0_88 = arith.constant 0 : index
      %183 = vector.load %arg6[%c0_87, %c0_88] : memref<8x256xf32, #tpu.memory_space<vmem>>, vector<8x256xf32>
      tpu.vector_store %arg6[%c0_87, %c0_88], %182 {strides = array<i32>} : memref<8x256xf32, #tpu.memory_space<vmem>>, vector<8x256xf32>,
    } else {
    }
    %c0 = arith.constant 0 : index
    %c0_1 = arith.constant 0 : index
    %3 = vector.load %arg3[%c0, %c0_1] : memref<256x256xbf16, #tpu.memory_space<vmem>>, vector<256x256xbf16>
    %c0_2 = arith.constant 0 : index
    %c0_3 = arith.constant 0 : index
    %4 = vector.load %arg6[%c0_2, %c0_3] : memref<8x256xf32, #tpu.memory_space<vmem>>, vector<8x256xf32>
    %c0_i32_4 = arith.constant 0 : i32
    %c7_i32 = arith.constant 7 : i32
    %5 = arith.subi %c7_i32, %c0_i32_4 : i32
    %6 = arith.index_cast %c0_i32_4 : i32 to index
    %c0_5 = arith.constant 0 : index
    %c0_6 = arith.constant 0 : index
    %7 = vector.load %arg1[%6, %c0_5, %c0_6] : memref<8x8x128xf32, #tpu.memory_space<vmem>>, vector<1x8x128xf32>
    %8 = vector.shape_cast %7 : vector<1x8x128xf32> to vector<8x128xf32>
    %9 = arith.index_cast %5 : i32 to index
    %c0_7 = arith.constant 0 : index
    %c0_8 = arith.constant 0 : index
    %10 = vector.load %arg2[%9, %c0_7, %c0_8] : memref<8x8x128xf32, #tpu.memory_space<vmem>>, vector<1x8x128xf32>
    %11 = vector.shape_cast %10 : vector<1x8x128xf32> to vector<8x128xf32>
    %12 = tpu.concatenate %8, %11 in 1 : vector<8x128xf32>, vector<8x128xf32> -> vector<8x256xf32>
    %13 = arith.truncf %4 : vector<8x256xf32> to vector<8x256xbf16>
    %cst = arith.constant dense<0.000000e+00> : vector<8x256xf32>
    %14 = tpu.matmul %13, %3, %cst {dimension_numbers = #tpu.dot_dimension_numbers<[1], [0], [0], [1], [0, 0, 1, 1], [], []>} : vector<8x256xbf16>, vector<256x256xbf16>, vector<8x256xf32> -> vector<8x256xf32>
    %15 = arith.addf %12, %14 : vector<8x256xf32>
    %16 = math.tanh %15 : vector<8x256xf32>
    %17 = vector.extract_strided_slice %16 {offsets = [0, 0], sizes = [8, 128], strides = [1, 1]} : vector<8x256xf32> to vector<8x128xf32>
    %18 = arith.index_cast %c0_i32_4 : i32 to index
    %c0_9 = arith.constant 0 : index
    %c0_10 = arith.constant 0 : index
    %19 = vector.load %arg4[%18, %c0_9, %c0_10] : memref<8x8x128xf32, #tpu.memory_space<vmem>>, vector<1x8x128xf32>
    %20 = vector.shape_cast %19 : vector<1x8x128xf32> to vector<8x128xf32>
    %21 = vector.shape_cast %17 : vector<8x128xf32> to vector<1x8x128xf32>
    tpu.vector_store %arg4[%18, %c0_9, %c0_10], %21 {strides = array<i32>} : memref<8x8x128xf32, #tpu.memory_space<vmem>>, vector<1x8x128xf32>,
    %22 = vector.extract_strided_slice %16 {offsets = [0, 128], sizes = [8, 128], strides = [1, 1]} : vector<8x256xf32> to vector<8x128xf32>
    %23 = arith.index_cast %5 : i32 to index
    %c0_11 = arith.constant 0 : index
    %c0_12 = arith.constant 0 : index
    %24 = vector.load %arg5[%23, %c0_11, %c0_12] : memref<8x8x128xf32, #tpu.memory_space<vmem>>, vector<1x8x128xf32>
    %25 = vector.shape_cast %24 : vector<1x8x128xf32> to vector<8x128xf32>
    %26 = vector.shape_cast %22 : vector<8x128xf32> to vector<1x8x128xf32>
    tpu.vector_store %arg5[%23, %c0_11, %c0_12], %26 {strides = array<i32>} : memref<8x8x128xf32, #tpu.memory_space<vmem>>, vector<1x8x128xf32>,
    %c1_i32 = arith.constant 1 : i32
    %c7_i32_13 = arith.constant 7 : i32
    %27 = arith.subi %c7_i32_13, %c1_i32 : i32
    %28 = arith.index_cast %c1_i32 : i32 to index
    %c0_14 = arith.constant 0 : index
    %c0_15 = arith.constant 0 : index
    %29 = vector.load %arg1[%28, %c0_14, %c0_15] : memref<8x8x128xf32, #tpu.memory_space<vmem>>, vector<1x8x128xf32>
    %30 = vector.shape_cast %29 : vector<1x8x128xf32> to vector<8x128xf32>
    %31 = arith.index_cast %27 : i32 to index
    %c0_16 = arith.constant 0 : index
    %c0_17 = arith.constant 0 : index
    %32 = vector.load %arg2[%31, %c0_16, %c0_17] : memref<8x8x128xf32, #tpu.memory_space<vmem>>, vector<1x8x128xf32>
    %33 = vector.shape_cast %32 : vector<1x8x128xf32> to vector<8x128xf32>
    %34 = tpu.concatenate %30, %33 in 1 : vector<8x128xf32>, vector<8x128xf32> -> vector<8x256xf32>
    %35 = arith.truncf %16 : vector<8x256xf32> to vector<8x256xbf16>
    %cst_18 = arith.constant dense<0.000000e+00> : vector<8x256xf32>
    %36 = tpu.matmul %35, %3, %cst_18 {dimension_numbers = #tpu.dot_dimension_numbers<[1], [0], [0], [1], [0, 0, 1, 1], [], []>} : vector<8x256xbf16>, vector<256x256xbf16>, vector<8x256xf32> -> vector<8x256xf32>
    %37 = arith.addf %34, %36 : vector<8x256xf32>
    %38 = math.tanh %37 : vector<8x256xf32>
    %39 = vector.extract_strided_slice %38 {offsets = [0, 0], sizes = [8, 128], strides = [1, 1]} : vector<8x256xf32> to vector<8x128xf32>
    %40 = arith.index_cast %c1_i32 : i32 to index
    %c0_19 = arith.constant 0 : index
    %c0_20 = arith.constant 0 : index
    %41 = vector.load %arg4[%40, %c0_19, %c0_20] : memref<8x8x128xf32, #tpu.memory_space<vmem>>, vector<1x8x128xf32>
    %42 = vector.shape_cast %41 : vector<1x8x128xf32> to vector<8x128xf32>
    %43 = vector.shape_cast %39 : vector<8x128xf32> to vector<1x8x128xf32>
    tpu.vector_store %arg4[%40, %c0_19, %c0_20], %43 {strides = array<i32>} : memref<8x8x128xf32, #tpu.memory_space<vmem>>, vector<1x8x128xf32>,
    %44 = vector.extract_strided_slice %38 {offsets = [0, 128], sizes = [8, 128], strides = [1, 1]} : vector<8x256xf32> to vector<8x128xf32>
    %45 = arith.index_cast %27 : i32 to index
    %c0_21 = arith.constant 0 : index
    %c0_22 = arith.constant 0 : index
    %46 = vector.load %arg5[%45, %c0_21, %c0_22] : memref<8x8x128xf32, #tpu.memory_space<vmem>>, vector<1x8x128xf32>
    %47 = vector.shape_cast %46 : vector<1x8x128xf32> to vector<8x128xf32>
    %48 = vector.shape_cast %44 : vector<8x128xf32> to vector<1x8x128xf32>
    tpu.vector_store %arg5[%45, %c0_21, %c0_22], %48 {strides = array<i32>} : memref<8x8x128xf32, #tpu.memory_space<vmem>>, vector<1x8x128xf32>,
    %c2_i32 = arith.constant 2 : i32
    %c7_i32_23 = arith.constant 7 : i32
    %49 = arith.subi %c7_i32_23, %c2_i32 : i32
    %50 = arith.index_cast %c2_i32 : i32 to index
    %c0_24 = arith.constant 0 : index
    %c0_25 = arith.constant 0 : index
    %51 = vector.load %arg1[%50, %c0_24, %c0_25] : memref<8x8x128xf32, #tpu.memory_space<vmem>>, vector<1x8x128xf32>
    %52 = vector.shape_cast %51 : vector<1x8x128xf32> to vector<8x128xf32>
    %53 = arith.index_cast %49 : i32 to index
    %c0_26 = arith.constant 0 : index
    %c0_27 = arith.constant 0 : index
    %54 = vector.load %arg2[%53, %c0_26, %c0_27] : memref<8x8x128xf32, #tpu.memory_space<vmem>>, vector<1x8x128xf32>
    %55 = vector.shape_cast %54 : vector<1x8x128xf32> to vector<8x128xf32>
    %56 = tpu.concatenate %52, %55 in 1 : vector<8x128xf32>, vector<8x128xf32> -> vector<8x256xf32>
    %57 = arith.truncf %38 : vector<8x256xf32> to vector<8x256xbf16>
    %cst_28 = arith.constant dense<0.000000e+00> : vector<8x256xf32>
    %58 = tpu.matmul %57, %3, %cst_28 {dimension_numbers = #tpu.dot_dimension_numbers<[1], [0], [0], [1], [0, 0, 1, 1], [], []>} : vector<8x256xbf16>, vector<256x256xbf16>, vector<8x256xf32> -> vector<8x256xf32>
    %59 = arith.addf %56, %58 : vector<8x256xf32>
    %60 = math.tanh %59 : vector<8x256xf32>
    %61 = vector.extract_strided_slice %60 {offsets = [0, 0], sizes = [8, 128], strides = [1, 1]} : vector<8x256xf32> to vector<8x128xf32>
    %62 = arith.index_cast %c2_i32 : i32 to index
    %c0_29 = arith.constant 0 : index
    %c0_30 = arith.constant 0 : index
    %63 = vector.load %arg4[%62, %c0_29, %c0_30] : memref<8x8x128xf32, #tpu.memory_space<vmem>>, vector<1x8x128xf32>
    %64 = vector.shape_cast %63 : vector<1x8x128xf32> to vector<8x128xf32>
    %65 = vector.shape_cast %61 : vector<8x128xf32> to vector<1x8x128xf32>
    tpu.vector_store %arg4[%62, %c0_29, %c0_30], %65 {strides = array<i32>} : memref<8x8x128xf32, #tpu.memory_space<vmem>>, vector<1x8x128xf32>,
    %66 = vector.extract_strided_slice %60 {offsets = [0, 128], sizes = [8, 128], strides = [1, 1]} : vector<8x256xf32> to vector<8x128xf32>
    %67 = arith.index_cast %49 : i32 to index
    %c0_31 = arith.constant 0 : index
    %c0_32 = arith.constant 0 : index
    %68 = vector.load %arg5[%67, %c0_31, %c0_32] : memref<8x8x128xf32, #tpu.memory_space<vmem>>, vector<1x8x128xf32>
    %69 = vector.shape_cast %68 : vector<1x8x128xf32> to vector<8x128xf32>
    %70 = vector.shape_cast %66 : vector<8x128xf32> to vector<1x8x128xf32>
    tpu.vector_store %arg5[%67, %c0_31, %c0_32], %70 {strides = array<i32>} : memref<8x8x128xf32, #tpu.memory_space<vmem>>, vector<1x8x128xf32>,
    %c3_i32 = arith.constant 3 : i32
    %c7_i32_33 = arith.constant 7 : i32
    %71 = arith.subi %c7_i32_33, %c3_i32 : i32
    %72 = arith.index_cast %c3_i32 : i32 to index
    %c0_34 = arith.constant 0 : index
    %c0_35 = arith.constant 0 : index
    %73 = vector.load %arg1[%72, %c0_34, %c0_35] : memref<8x8x128xf32, #tpu.memory_space<vmem>>, vector<1x8x128xf32>
    %74 = vector.shape_cast %73 : vector<1x8x128xf32> to vector<8x128xf32>
    %75 = arith.index_cast %71 : i32 to index
    %c0_36 = arith.constant 0 : index
    %c0_37 = arith.constant 0 : index
    %76 = vector.load %arg2[%75, %c0_36, %c0_37] : memref<8x8x128xf32, #tpu.memory_space<vmem>>, vector<1x8x128xf32>
    %77 = vector.shape_cast %76 : vector<1x8x128xf32> to vector<8x128xf32>
    %78 = tpu.concatenate %74, %77 in 1 : vector<8x128xf32>, vector<8x128xf32> -> vector<8x256xf32>
    %79 = arith.truncf %60 : vector<8x256xf32> to vector<8x256xbf16>
    %cst_38 = arith.constant dense<0.000000e+00> : vector<8x256xf32>
    %80 = tpu.matmul %79, %3, %cst_38 {dimension_numbers = #tpu.dot_dimension_numbers<[1], [0], [0], [1], [0, 0, 1, 1], [], []>} : vector<8x256xbf16>, vector<256x256xbf16>, vector<8x256xf32> -> vector<8x256xf32>
    %81 = arith.addf %78, %80 : vector<8x256xf32>
    %82 = math.tanh %81 : vector<8x256xf32>
    %83 = vector.extract_strided_slice %82 {offsets = [0, 0], sizes = [8, 128], strides = [1, 1]} : vector<8x256xf32> to vector<8x128xf32>
    %84 = arith.index_cast %c3_i32 : i32 to index
    %c0_39 = arith.constant 0 : index
    %c0_40 = arith.constant 0 : index
    %85 = vector.load %arg4[%84, %c0_39, %c0_40] : memref<8x8x128xf32, #tpu.memory_space<vmem>>, vector<1x8x128xf32>
    %86 = vector.shape_cast %85 : vector<1x8x128xf32> to vector<8x128xf32>
    %87 = vector.shape_cast %83 : vector<8x128xf32> to vector<1x8x128xf32>
    tpu.vector_store %arg4[%84, %c0_39, %c0_40], %87 {strides = array<i32>} : memref<8x8x128xf32, #tpu.memory_space<vmem>>, vector<1x8x128xf32>,
    %88 = vector.extract_strided_slice %82 {offsets = [0, 128], sizes = [8, 128], strides = [1, 1]} : vector<8x256xf32> to vector<8x128xf32>
    %89 = arith.index_cast %71 : i32 to index
    %c0_41 = arith.constant 0 : index
    %c0_42 = arith.constant 0 : index
    %90 = vector.load %arg5[%89, %c0_41, %c0_42] : memref<8x8x128xf32, #tpu.memory_space<vmem>>, vector<1x8x128xf32>
    %91 = vector.shape_cast %90 : vector<1x8x128xf32> to vector<8x128xf32>
    %92 = vector.shape_cast %88 : vector<8x128xf32> to vector<1x8x128xf32>
    tpu.vector_store %arg5[%89, %c0_41, %c0_42], %92 {strides = array<i32>} : memref<8x8x128xf32, #tpu.memory_space<vmem>>, vector<1x8x128xf32>,
    %c4_i32 = arith.constant 4 : i32
    %c7_i32_43 = arith.constant 7 : i32
    %93 = arith.subi %c7_i32_43, %c4_i32 : i32
    %94 = arith.index_cast %c4_i32 : i32 to index
    %c0_44 = arith.constant 0 : index
    %c0_45 = arith.constant 0 : index
    %95 = vector.load %arg1[%94, %c0_44, %c0_45] : memref<8x8x128xf32, #tpu.memory_space<vmem>>, vector<1x8x128xf32>
    %96 = vector.shape_cast %95 : vector<1x8x128xf32> to vector<8x128xf32>
    %97 = arith.index_cast %93 : i32 to index
    %c0_46 = arith.constant 0 : index
    %c0_47 = arith.constant 0 : index
    %98 = vector.load %arg2[%97, %c0_46, %c0_47] : memref<8x8x128xf32, #tpu.memory_space<vmem>>, vector<1x8x128xf32>
    %99 = vector.shape_cast %98 : vector<1x8x128xf32> to vector<8x128xf32>
    %100 = tpu.concatenate %96, %99 in 1 : vector<8x128xf32>, vector<8x128xf32> -> vector<8x256xf32>
    %101 = arith.truncf %82 : vector<8x256xf32> to vector<8x256xbf16>
    %cst_48 = arith.constant dense<0.000000e+00> : vector<8x256xf32>
    %102 = tpu.matmul %101, %3, %cst_48 {dimension_numbers = #tpu.dot_dimension_numbers<[1], [0], [0], [1], [0, 0, 1, 1], [], []>} : vector<8x256xbf16>, vector<256x256xbf16>, vector<8x256xf32> -> vector<8x256xf32>
    %103 = arith.addf %100, %102 : vector<8x256xf32>
    %104 = math.tanh %103 : vector<8x256xf32>
    %105 = vector.extract_strided_slice %104 {offsets = [0, 0], sizes = [8, 128], strides = [1, 1]} : vector<8x256xf32> to vector<8x128xf32>
    %106 = arith.index_cast %c4_i32 : i32 to index
    %c0_49 = arith.constant 0 : index
    %c0_50 = arith.constant 0 : index
    %107 = vector.load %arg4[%106, %c0_49, %c0_50] : memref<8x8x128xf32, #tpu.memory_space<vmem>>, vector<1x8x128xf32>
    %108 = vector.shape_cast %107 : vector<1x8x128xf32> to vector<8x128xf32>
    %109 = vector.shape_cast %105 : vector<8x128xf32> to vector<1x8x128xf32>
    tpu.vector_store %arg4[%106, %c0_49, %c0_50], %109 {strides = array<i32>} : memref<8x8x128xf32, #tpu.memory_space<vmem>>, vector<1x8x128xf32>,
    %110 = vector.extract_strided_slice %104 {offsets = [0, 128], sizes = [8, 128], strides = [1, 1]} : vector<8x256xf32> to vector<8x128xf32>
    %111 = arith.index_cast %93 : i32 to index
    %c0_51 = arith.constant 0 : index
    %c0_52 = arith.constant 0 : index
    %112 = vector.load %arg5[%111, %c0_51, %c0_52] : memref<8x8x128xf32, #tpu.memory_space<vmem>>, vector<1x8x128xf32>
    %113 = vector.shape_cast %112 : vector<1x8x128xf32> to vector<8x128xf32>
    %114 = vector.shape_cast %110 : vector<8x128xf32> to vector<1x8x128xf32>
    tpu.vector_store %arg5[%111, %c0_51, %c0_52], %114 {strides = array<i32>} : memref<8x8x128xf32, #tpu.memory_space<vmem>>, vector<1x8x128xf32>,
    %c5_i32 = arith.constant 5 : i32
    %c7_i32_53 = arith.constant 7 : i32
    %115 = arith.subi %c7_i32_53, %c5_i32 : i32
    %116 = arith.index_cast %c5_i32 : i32 to index
    %c0_54 = arith.constant 0 : index
    %c0_55 = arith.constant 0 : index
    %117 = vector.load %arg1[%116, %c0_54, %c0_55] : memref<8x8x128xf32, #tpu.memory_space<vmem>>, vector<1x8x128xf32>
    %118 = vector.shape_cast %117 : vector<1x8x128xf32> to vector<8x128xf32>
    %119 = arith.index_cast %115 : i32 to index
    %c0_56 = arith.constant 0 : index
    %c0_57 = arith.constant 0 : index
    %120 = vector.load %arg2[%119, %c0_56, %c0_57] : memref<8x8x128xf32, #tpu.memory_space<vmem>>, vector<1x8x128xf32>
    %121 = vector.shape_cast %120 : vector<1x8x128xf32> to vector<8x128xf32>
    %122 = tpu.concatenate %118, %121 in 1 : vector<8x128xf32>, vector<8x128xf32> -> vector<8x256xf32>
    %123 = arith.truncf %104 : vector<8x256xf32> to vector<8x256xbf16>
    %cst_58 = arith.constant dense<0.000000e+00> : vector<8x256xf32>
    %124 = tpu.matmul %123, %3, %cst_58 {dimension_numbers = #tpu.dot_dimension_numbers<[1], [0], [0], [1], [0, 0, 1, 1], [], []>} : vector<8x256xbf16>, vector<256x256xbf16>, vector<8x256xf32> -> vector<8x256xf32>
    %125 = arith.addf %122, %124 : vector<8x256xf32>
    %126 = math.tanh %125 : vector<8x256xf32>
    %127 = vector.extract_strided_slice %126 {offsets = [0, 0], sizes = [8, 128], strides = [1, 1]} : vector<8x256xf32> to vector<8x128xf32>
    %128 = arith.index_cast %c5_i32 : i32 to index
    %c0_59 = arith.constant 0 : index
    %c0_60 = arith.constant 0 : index
    %129 = vector.load %arg4[%128, %c0_59, %c0_60] : memref<8x8x128xf32, #tpu.memory_space<vmem>>, vector<1x8x128xf32>
    %130 = vector.shape_cast %129 : vector<1x8x128xf32> to vector<8x128xf32>
    %131 = vector.shape_cast %127 : vector<8x128xf32> to vector<1x8x128xf32>
    tpu.vector_store %arg4[%128, %c0_59, %c0_60], %131 {strides = array<i32>} : memref<8x8x128xf32, #tpu.memory_space<vmem>>, vector<1x8x128xf32>,
    %132 = vector.extract_strided_slice %126 {offsets = [0, 128], sizes = [8, 128], strides = [1, 1]} : vector<8x256xf32> to vector<8x128xf32>
    %133 = arith.index_cast %115 : i32 to index
    %c0_61 = arith.constant 0 : index
    %c0_62 = arith.constant 0 : index
    %134 = vector.load %arg5[%133, %c0_61, %c0_62] : memref<8x8x128xf32, #tpu.memory_space<vmem>>, vector<1x8x128xf32>
    %135 = vector.shape_cast %134 : vector<1x8x128xf32> to vector<8x128xf32>
    %136 = vector.shape_cast %132 : vector<8x128xf32> to vector<1x8x128xf32>
    tpu.vector_store %arg5[%133, %c0_61, %c0_62], %136 {strides = array<i32>} : memref<8x8x128xf32, #tpu.memory_space<vmem>>, vector<1x8x128xf32>,
    %c6_i32 = arith.constant 6 : i32
    %c7_i32_63 = arith.constant 7 : i32
    %137 = arith.subi %c7_i32_63, %c6_i32 : i32
    %138 = arith.index_cast %c6_i32 : i32 to index
    %c0_64 = arith.constant 0 : index
    %c0_65 = arith.constant 0 : index
    %139 = vector.load %arg1[%138, %c0_64, %c0_65] : memref<8x8x128xf32, #tpu.memory_space<vmem>>, vector<1x8x128xf32>
    %140 = vector.shape_cast %139 : vector<1x8x128xf32> to vector<8x128xf32>
    %141 = arith.index_cast %137 : i32 to index
    %c0_66 = arith.constant 0 : index
    %c0_67 = arith.constant 0 : index
    %142 = vector.load %arg2[%141, %c0_66, %c0_67] : memref<8x8x128xf32, #tpu.memory_space<vmem>>, vector<1x8x128xf32>
    %143 = vector.shape_cast %142 : vector<1x8x128xf32> to vector<8x128xf32>
    %144 = tpu.concatenate %140, %143 in 1 : vector<8x128xf32>, vector<8x128xf32> -> vector<8x256xf32>
    %145 = arith.truncf %126 : vector<8x256xf32> to vector<8x256xbf16>
    %cst_68 = arith.constant dense<0.000000e+00> : vector<8x256xf32>
    %146 = tpu.matmul %145, %3, %cst_68 {dimension_numbers = #tpu.dot_dimension_numbers<[1], [0], [0], [1], [0, 0, 1, 1], [], []>} : vector<8x256xbf16>, vector<256x256xbf16>, vector<8x256xf32> -> vector<8x256xf32>
    %147 = arith.addf %144, %146 : vector<8x256xf32>
    %148 = math.tanh %147 : vector<8x256xf32>
    %149 = vector.extract_strided_slice %148 {offsets = [0, 0], sizes = [8, 128], strides = [1, 1]} : vector<8x256xf32> to vector<8x128xf32>
    %150 = arith.index_cast %c6_i32 : i32 to index
    %c0_69 = arith.constant 0 : index
    %c0_70 = arith.constant 0 : index
    %151 = vector.load %arg4[%150, %c0_69, %c0_70] : memref<8x8x128xf32, #tpu.memory_space<vmem>>, vector<1x8x128xf32>
    %152 = vector.shape_cast %151 : vector<1x8x128xf32> to vector<8x128xf32>
    %153 = vector.shape_cast %149 : vector<8x128xf32> to vector<1x8x128xf32>
    tpu.vector_store %arg4[%150, %c0_69, %c0_70], %153 {strides = array<i32>} : memref<8x8x128xf32, #tpu.memory_space<vmem>>, vector<1x8x128xf32>,
    %154 = vector.extract_strided_slice %148 {offsets = [0, 128], sizes = [8, 128], strides = [1, 1]} : vector<8x256xf32> to vector<8x128xf32>
    %155 = arith.index_cast %137 : i32 to index
    %c0_71 = arith.constant 0 : index
    %c0_72 = arith.constant 0 : index
    %156 = vector.load %arg5[%155, %c0_71, %c0_72] : memref<8x8x128xf32, #tpu.memory_space<vmem>>, vector<1x8x128xf32>
    %157 = vector.shape_cast %156 : vector<1x8x128xf32> to vector<8x128xf32>
    %158 = vector.shape_cast %154 : vector<8x128xf32> to vector<1x8x128xf32>
    tpu.vector_store %arg5[%155, %c0_71, %c0_72], %158 {strides = array<i32>} : memref<8x8x128xf32, #tpu.memory_space<vmem>>, vector<1x8x128xf32>,
    %c7_i32_73 = arith.constant 7 : i32
    %c7_i32_74 = arith.constant 7 : i32
    %159 = arith.subi %c7_i32_74, %c7_i32_73 : i32
    %160 = arith.index_cast %c7_i32_73 : i32 to index
    %c0_75 = arith.constant 0 : index
    %c0_76 = arith.constant 0 : index
    %161 = vector.load %arg1[%160, %c0_75, %c0_76] : memref<8x8x128xf32, #tpu.memory_space<vmem>>, vector<1x8x128xf32>
    %162 = vector.shape_cast %161 : vector<1x8x128xf32> to vector<8x128xf32>
    %163 = arith.index_cast %159 : i32 to index
    %c0_77 = arith.constant 0 : index
    %c0_78 = arith.constant 0 : index
    %164 = vector.load %arg2[%163, %c0_77, %c0_78] : memref<8x8x128xf32, #tpu.memory_space<vmem>>, vector<1x8x128xf32>
    %165 = vector.shape_cast %164 : vector<1x8x128xf32> to vector<8x128xf32>
    %166 = tpu.concatenate %162, %165 in 1 : vector<8x128xf32>, vector<8x128xf32> -> vector<8x256xf32>
    %167 = arith.truncf %148 : vector<8x256xf32> to vector<8x256xbf16>
    %cst_79 = arith.constant dense<0.000000e+00> : vector<8x256xf32>
    %168 = tpu.matmul %167, %3, %cst_79 {dimension_numbers = #tpu.dot_dimension_numbers<[1], [0], [0], [1], [0, 0, 1, 1], [], []>} : vector<8x256xbf16>, vector<256x256xbf16>, vector<8x256xf32> -> vector<8x256xf32>
    %169 = arith.addf %166, %168 : vector<8x256xf32>
    %170 = math.tanh %169 : vector<8x256xf32>
    %171 = vector.extract_strided_slice %170 {offsets = [0, 0], sizes = [8, 128], strides = [1, 1]} : vector<8x256xf32> to vector<8x128xf32>
    %172 = arith.index_cast %c7_i32_73 : i32 to index
    %c0_80 = arith.constant 0 : index
    %c0_81 = arith.constant 0 : index
    %173 = vector.load %arg4[%172, %c0_80, %c0_81] : memref<8x8x128xf32, #tpu.memory_space<vmem>>, vector<1x8x128xf32>
    %174 = vector.shape_cast %173 : vector<1x8x128xf32> to vector<8x128xf32>
    %175 = vector.shape_cast %171 : vector<8x128xf32> to vector<1x8x128xf32>
    tpu.vector_store %arg4[%172, %c0_80, %c0_81], %175 {strides = array<i32>} : memref<8x8x128xf32, #tpu.memory_space<vmem>>, vector<1x8x128xf32>,
    %176 = vector.extract_strided_slice %170 {offsets = [0, 128], sizes = [8, 128], strides = [1, 1]} : vector<8x256xf32> to vector<8x128xf32>
    %177 = arith.index_cast %159 : i32 to index
    %c0_82 = arith.constant 0 : index
    %c0_83 = arith.constant 0 : index
    %178 = vector.load %arg5[%177, %c0_82, %c0_83] : memref<8x8x128xf32, #tpu.memory_space<vmem>>, vector<1x8x128xf32>
    %179 = vector.shape_cast %178 : vector<1x8x128xf32> to vector<8x128xf32>
    %180 = vector.shape_cast %176 : vector<8x128xf32> to vector<1x8x128xf32>
    tpu.vector_store %arg5[%177, %c0_82, %c0_83], %180 {strides = array<i32>} : memref<8x8x128xf32, #tpu.memory_space<vmem>>, vector<1x8x128xf32>,
    %c8_i32 = arith.constant 8 : i32
    %c0_84 = arith.constant 0 : index
    %c0_85 = arith.constant 0 : index
    %181 = vector.load %arg6[%c0_84, %c0_85] : memref<8x256xf32, #tpu.memory_space<vmem>>, vector<8x256xf32>
    tpu.vector_store %arg6[%c0_84, %c0_85], %170 {strides = array<i32>} : memref<8x256xf32, #tpu.memory_space<vmem>>, vector<8x256xf32>,
    return
  }
  func.func @transform_0(%arg0: i32) -> (i32, i32, i32) {
    %c0_i32 = arith.constant 0 : i32
    %c0_i32_0 = arith.constant 0 : i32
    %c0_i32_1 = arith.constant 0 : i32
    return %arg0, %c0_i32, %c0_i32_0 : i32, i32, i32
  }
  func.func @transform_1(%arg0: i32) -> (i32, i32, i32) {
    %c0_i32 = arith.constant 0 : i32
    %0 = arith.subi %c0_i32, %arg0 : i32
    %c0_i32_0 = arith.constant 0 : i32
    %c1_i32 = arith.constant 1 : i32
    %c0_i32_1 = arith.constant 0 : i32
    return %0, %c0_i32_0, %c1_i32 : i32, i32, i32
  }
  func.func @transform_2(%arg0: i32) -> (i32, i32) {
    %c0_i32 = arith.constant 0 : i32
    %c0_i32_0 = arith.constant 0 : i32
    %c0_i32_1 = arith.constant 0 : i32
    return %c0_i32, %c0_i32_0 : i32, i32
  }
  func.func @transform_3(%arg0: i32) -> (i32, i32, i32) {
    %c0_i32 = arith.constant 0 : i32
    %c0_i32_0 = arith.constant 0 : i32
    %c0_i32_1 = arith.constant 0 : i32
    return %arg0, %c0_i32, %c0_i32_0 : i32, i32, i32
  }
  func.func @transform_4(%arg0: i32) -> (i32, i32, i32) {
    %c0_i32 = arith.constant 0 : i32
    %0 = arith.subi %c0_i32, %arg0 : i32
    %c0_i32_0 = arith.constant 0 : i32
    %c0_i32_1 = arith.constant 0 : i32
    %c0_i32_2 = arith.constant 0 : i32
    return %0, %c0_i32_0, %c0_i32_1 : i32, i32, i32
  }
}

</mosaic_0001>

<bundles_post_ra>
// kernel: attn_rnn_enc_forward.6
= control target key start
LH: loop header
LB: loop body
LE: loop exit
PB: predicated region body
PF: predicated region fallthrough
CT: control target
= control target key end

     0   :  { %v75_v56 = vlaneseq  ;;  %s670_s2 = inlined_call_operand.vmem [shape: bf16[256,256], index: 2, kind: input, shape index: {}]   ;;  %s671_s1 = inlined_call_operand.vmem [shape: f32[64,128], index: 1, kind: input, shape index: {}]   ;;  %s672_s0 = inlined_call_operand.vmem [shape: f32[64,128], index: 0, kind: input, shape index: {}]   ;;  %s673_s3 = inlined_call_operand.vmem [shape: f32[1,256], index: 3, kind: input, shape index: {}]   ;;  %s674_s4 = inlined_call_operand.vmem [shape: f32[64,256], index: 4, kind: output, shape index: {}]  }
   0x1   :  { %v402_v0 = vld [vmem:[%s670_s2 + $0x4] ss:$8 sps:$4 sm:$0xff]   ;;  %v404_v1 = vld [vmem:[%s670_s2] ss:$8 sps:$4 sm:$0xff]   ;;  %v405_v2 = vld [vmem:[%s670_s2 + $0x14] ss:$8 sps:$4 sm:$0xff]  }
   0x2   :  { %245 = vmatprep.subr.bf16.mxu0 %v402_v0  ;;  %370 = vmatprep.subr.bf16.mxu1 %v402_v0  ;;  %v407_v3 = vld [vmem:[%s670_s2 + $0x10] ss:$8 sps:$4 sm:$0xff]   ;;  %v408_v4 = vld [vmem:[%s670_s2 + $0x24] ss:$8 sps:$4 sm:$0xff]   ;;  %v410_v5 = vld [vmem:[%s670_s2 + $0x20] ss:$8 sps:$4 sm:$0xff]  }
   0x3   :  { %246 = vmatpush1.bf16.msra.mxu0 %v404_v1  ;;  %386 = vmatpush1.bf16.msra.mxu1 %v404_v1  ;;  %v411_v6 = vld [vmem:[%s670_s2 + $0x34] ss:$8 sps:$4 sm:$0xff]   ;;  %v413_v7 = vld [vmem:[%s670_s2 + $0x30] ss:$8 sps:$4 sm:$0xff]   ;;  %v414_v8 = vld [vmem:[%s670_s2 + $0x44] ss:$8 sps:$4 sm:$0xff]  }
   0x4   :  { %247 = vmatprep.subr.bf16.mxu0 %v405_v2  ;;  %371 = vmatprep.subr.bf16.mxu1 %v405_v2  ;;  %v416_v9 = vld [vmem:[%s670_s2 + $0x40] ss:$8 sps:$4 sm:$0xff]   ;;  %v417_v10 = vld [vmem:[%s670_s2 + $0x54] ss:$8 sps:$4 sm:$0xff]   ;;  %v419_v11 = vld [vmem:[%s670_s2 + $0x50] ss:$8 sps:$4 sm:$0xff]  }
   0x5   :  { %v420_v12 = vld [vmem:[%s670_s2 + $0x64] ss:$8 sps:$4 sm:$0xff]   ;;  %v422_v18 = vld [vmem:[%s670_s2 + $0x60] ss:$8 sps:$4 sm:$0xff]   ;;  %v423_v20 = vld [vmem:[%s670_s2 + $0x74] ss:$8 sps:$4 sm:$0xff]  }
   0x6   :  { %v25_v13 = vld [vmem:[%s671_s1] sm:$0xff]  ;;  %v26_v14 = vld [vmem:[%s671_s1 + $0x8] sm:$0xff]  ;;  %v425_v21 = vld [vmem:[%s670_s2 + $0x70] ss:$8 sps:$4 sm:$0xff]   ;;  %v76_v57 = vshrl.u32 %v75_v56, 7 }
   0x7   :  { %248 = vmatpush1.bf16.msra.mxu0 %v407_v3  ;;  %387 = vmatpush1.bf16.msra.mxu1 %v407_v3  ;;  %v34_v15 = vpack.c.bf16 %v26_v14, %v25_v13  ;;  %v29_v16 = vld [vmem:[%s671_s1 + $0x20] sm:$0xff]  ;;  %v30_v17 = vld [vmem:[%s671_s1 + $0x28] sm:$0xff]  ;;  %v429_v24 = vld [vmem:[%s670_s2 + $0x94] ss:$8 sps:$4 sm:$0xff]  }
   0x8   :  { %249 = vmatprep.subr.bf16.mxu0 %v408_v4  ;;  %372 = vmatprep.subr.bf16.mxu1 %v408_v4  ;;  %v38_v19 = vpack.c.bf16 %v30_v17, %v29_v16  ;;  %v426_v22 = vld [vmem:[%s670_s2 + $0x84] ss:$8 sps:$4 sm:$0xff]   ;;  %v428_v23 = vld [vmem:[%s670_s2 + $0x80] ss:$8 sps:$4 sm:$0xff]   ;;  %v431_v25 = vld [vmem:[%s670_s2 + $0x90] ss:$8 sps:$4 sm:$0xff]  }
   0x9   :  { %277 = vmatprep.mubr.bf16.mxu0 %v34_v15  ;;  %v432_v26 = vld [vmem:[%s670_s2 + $0xa4] ss:$8 sps:$4 sm:$0xff]   ;;  %v434_v27 = vld [vmem:[%s670_s2 + $0xa0] ss:$8 sps:$4 sm:$0xff]   ;;  %v435_v28 = vld [vmem:[%s670_s2 + $0xb4] ss:$8 sps:$4 sm:$0xff]  }
   0xa   :  { %297 = vmatprep.mubr.bf16.mxu1 %v38_v19  ;;  %v437_v29 = vld [vmem:[%s670_s2 + $0xb0] ss:$8 sps:$4 sm:$0xff]   ;;  %v438_v30 = vld [vmem:[%s670_s2 + $0xc4] ss:$8 sps:$4 sm:$0xff]   ;;  %v440_v31 = vld [vmem:[%s670_s2 + $0xc0] ss:$8 sps:$4 sm:$0xff]  }
   0xb   :  { %250 = vmatpush1.bf16.msra.mxu0 %v410_v5  ;;  %388 = vmatpush1.bf16.msra.mxu1 %v410_v5  ;;  %v441_v32 = vld [vmem:[%s670_s2 + $0xd4] ss:$8 sps:$4 sm:$0xff]   ;;  %v443_v33 = vld [vmem:[%s670_s2 + $0xd0] ss:$8 sps:$4 sm:$0xff]   ;;  %v444_v34 = vld [vmem:[%s670_s2 + $0xe4] ss:$8 sps:$4 sm:$0xff]  }
   0xc   :  { %251 = vmatprep.subr.bf16.mxu0 %v411_v6  ;;  %373 = vmatprep.subr.bf16.mxu1 %v411_v6  ;;  %v446_v35 = vld [vmem:[%s670_s2 + $0xe0] ss:$8 sps:$4 sm:$0xff]   ;;  %v447_v36 = vld [vmem:[%s670_s2 + $0xf4] ss:$8 sps:$4 sm:$0xff]   ;;  %v449_v37 = vld [vmem:[%s670_s2 + $0xf0] ss:$8 sps:$4 sm:$0xff]  }
   0xd   :  { %v17_v38 = vld [vmem:[%s672_s0] sm:$0xff]  ;;  %v18_v39 = vld [vmem:[%s672_s0 + $0x8] sm:$0xff]  ;;  %v27_v42 = vld [vmem:[%s671_s1 + $0x10] sm:$0xff]  ;;  %v77_v58 = vsub.s32 0, %v76_v57  ;;  %v81_v60 = vsub.s32 1, %v76_v57 }
   0xe   :  { %v21_v40 = vld [vmem:[%s672_s0 + $0x20] sm:$0xff]  ;;  %v22_v41 = vld [vmem:[%s672_s0 + $0x28] sm:$0xff]  ;;  %v28_v43 = vld [vmem:[%s671_s1 + $0x18] sm:$0xff]  ;;  %v33_v46 = vpack.c.bf16 %v18_v39, %v17_v38 }
   0xf   :  { %252 = vmatpush1.bf16.msra.mxu0 %v413_v7  ;;  %389 = vmatpush1.bf16.msra.mxu1 %v413_v7  ;;  %v31_v44 = vld [vmem:[%s671_s1 + $0x30] sm:$0xff]  ;;  %v32_v45 = vld [vmem:[%s671_s1 + $0x38] sm:$0xff]  ;;  %v37_v47 = vpack.c.bf16 %v22_v41, %v21_v40  ;;  %v36_v48 = vpack.c.bf16 %v28_v43, %v27_v42  ;;  %v73_v59 = vld [vmem:[%s673_s3] sm:$0x3] }
  0x10   :  { %253 = vmatprep.subr.bf16.mxu0 %v414_v8  ;;  %374 = vmatprep.subr.bf16.mxu1 %v414_v8  ;;  %v40_v49 = vpack.c.bf16 %v32_v45, %v31_v44  ;;  %v19_v50 = vld [vmem:[%s672_s0 + $0x10] sm:$0xff]  ;;  %v20_v51 = vld [vmem:[%s672_s0 + $0x18] sm:$0xff]  ;;  %v78_v61 = vrot.slane %v73_v59, %v77_v58  ;;  %v82_v62 = vrot.slane %v73_v59, %v81_v60 }
  0x11   :  { %v23_v52 = vld [vmem:[%s672_s0 + $0x30] sm:$0xff]  ;;  %v24_v53 = vld [vmem:[%s672_s0 + $0x38] sm:$0xff]  ;;  %v35_v54 = vpack.c.bf16 %v20_v51, %v19_v50 }
  0x12   :  { %v39_v55 = vpack.c.bf16 %v24_v53, %v23_v52 }
  0x13   :  { %254 = vmatpush1.bf16.msra.mxu0 %v416_v9  ;;  %390 = vmatpush1.bf16.msra.mxu1 %v416_v9 }
  0x14   :  { %255 = vmatprep.subr.bf16.mxu0 %v417_v10  ;;  %375 = vmatprep.subr.bf16.mxu1 %v417_v10 }
  0x17   :  { %256 = vmatpush1.bf16.msra.mxu0 %v419_v11  ;;  %391 = vmatpush1.bf16.msra.mxu1 %v419_v11 }
  0x18   :  { %257 = vmatprep.subr.bf16.mxu0 %v420_v12  ;;  %376 = vmatprep.subr.bf16.mxu1 %v420_v12 }
  0x1b   :  { %258 = vmatpush1.bf16.msra.mxu0 %v422_v18  ;;  %392 = vmatpush1.bf16.msra.mxu1 %v422_v18 }
  0x1c   :  { %259 = vmatprep.subr.bf16.mxu0 %v423_v20  ;;  %377 = vmatprep.subr.bf16.mxu1 %v423_v20 }
  0x1f   :  { %260 = vmatpush1.bf16.msra.mxu0 %v425_v21  ;;  %393 = vmatpush1.bf16.msra.mxu1 %v425_v21 }
  0x20   :  { %261 = vmatprep.subr.bf16.mxu0 %v426_v22  ;;  %378 = vmatprep.subr.bf16.mxu1 %v426_v22 }
  0x23   :  { %262 = vmatpush1.bf16.msra.mxu0 %v428_v23  ;;  %394 = vmatpush1.bf16.msra.mxu1 %v428_v23 }
  0x24   :  { %263 = vmatprep.subr.bf16.mxu0 %v429_v24  ;;  %379 = vmatprep.subr.bf16.mxu1 %v429_v24 }
  0x27   :  { %264 = vmatpush1.bf16.msra.mxu0 %v431_v25  ;;  %395 = vmatpush1.bf16.msra.mxu1 %v431_v25 }
  0x28   :  { %265 = vmatprep.subr.bf16.mxu0 %v432_v26  ;;  %380 = vmatprep.subr.bf16.mxu1 %v432_v26 }
  0x2b   :  { %266 = vmatpush1.bf16.msra.mxu0 %v434_v27  ;;  %396 = vmatpush1.bf16.msra.mxu1 %v434_v27 }
  0x2c   :  { %267 = vmatprep.subr.bf16.mxu0 %v435_v28  ;;  %381 = vmatprep.subr.bf16.mxu1 %v435_v28 }
  0x2f   :  { %268 = vmatpush1.bf16.msra.mxu0 %v437_v29  ;;  %397 = vmatpush1.bf16.msra.mxu1 %v437_v29 }
  0x30   :  { %269 = vmatprep.subr.bf16.mxu0 %v438_v30  ;;  %382 = vmatprep.subr.bf16.mxu1 %v438_v30 }
  0x33   :  { %270 = vmatpush1.bf16.msra.mxu0 %v440_v31  ;;  %398 = vmatpush1.bf16.msra.mxu1 %v440_v31 }
  0x34   :  { %271 = vmatprep.subr.bf16.mxu0 %v441_v32  ;;  %383 = vmatprep.subr.bf16.mxu1 %v441_v32 }
  0x37   :  { %272 = vmatpush1.bf16.msra.mxu0 %v443_v33  ;;  %399 = vmatpush1.bf16.msra.mxu1 %v443_v33 }
  0x38   :  { %273 = vmatprep.subr.bf16.mxu0 %v444_v34  ;;  %384 = vmatprep.subr.bf16.mxu1 %v444_v34 }
  0x3b   :  { %274 = vmatpush1.bf16.msra.mxu0 %v446_v35  ;;  %400 = vmatpush1.bf16.msra.mxu1 %v446_v35 }
  0x3c   :  { %275 = vmatprep.subr.bf16.mxu0 %v447_v36  ;;  %385 = vmatprep.subr.bf16.mxu1 %v447_v36 }
  0x3f   :  { %276 = vmatpush1.bf16.msra.mxu0 %v449_v37  ;;  %401 = vmatpush1.bf16.msra.mxu1 %v449_v37 }
  0x42   :  { %278 = vmatmul.mubr.bf16.vlgmr.msra.gmra.mrb[0].mxu0 %v33_v46  ;;  %298 = vmatmul.mubr.bf16.vlgmr.msra.gmra.mrb[0].mxu1 %v37_v47 }
  0x43   :  { %287 = vmatprep.mubr.bf16.mxu0 %v36_v48  ;;  %307 = vmatprep.mubr.bf16.mxu1 %v40_v49 }
  0x4a   :  { %288 = vmatmul.mubr.bf16.gmra.mrb[4].mxu0 %v35_v54  ;;  %308 = vmatmul.mubr.bf16.gmra.mrb[4].mxu1 %v39_v55 }
 0x115   :  { %v279_v63 = vpop.f32.mrb[0].mxu0  ;;  %v299_v0 = vpop.f32.mrb[0].mxu1 }
 0x116   :  { %v280_v1 = vadd.f32 %v279_v63, %v78_v61  ;;  %v300_v2 = vadd.f32 %v299_v0, %v78_v61  ;;  %v281_v3 = vpop.f32.mrb[1].mxu0  ;;  %v301_v4 = vpop.f32.mrb[1].mxu1 }
 0x117   :  { %v282_v5 = vadd.f32 %v281_v3, %v82_v62  ;;  %v302_v6 = vadd.f32 %v301_v4, %v82_v62  ;;  %v283_v7 = vpop.f32.mrb[2].mxu0  ;;  %v303_v8 = vpop.f32.mrb[2].mxu1 }
 0x118   :  { %318 = vst [vmem:[%s674_s4] sm:$0xff] %v280_v1  ;;  %326 = vst [vmem:[%s674_s4 + $0x40] sm:$0xff] %v300_v2  ;;  %v284_v9 = vadd.f32 %v283_v7, %v78_v61  ;;  %v304_v10 = vadd.f32 %v303_v8, %v78_v61  ;;  %v285_v11 = vpop.f32.mrb[3].mxu0  ;;  %v305_v12 = vpop.f32.mrb[3].mxu1 }
 0x119   :  { %319 = vst [vmem:[%s674_s4 + $0x8] sm:$0xff] %v282_v5  ;;  %327 = vst [vmem:[%s674_s4 + $0x48] sm:$0xff] %v302_v6  ;;  %v286_v13 = vadd.f32 %v285_v11, %v82_v62  ;;  %v306_v14 = vadd.f32 %v305_v12, %v82_v62 }
 0x11a   :  { %320 = vst [vmem:[%s674_s4 + $0x10] sm:$0xff] %v284_v9  ;;  %328 = vst [vmem:[%s674_s4 + $0x50] sm:$0xff] %v304_v10 }
 0x11b   :  { %321 = vst [vmem:[%s674_s4 + $0x18] sm:$0xff] %v286_v13  ;;  %329 = vst [vmem:[%s674_s4 + $0x58] sm:$0xff] %v306_v14 }
 0x11d   :  { %v289_v15 = vpop.f32.mrb[4].mxu0  ;;  %v309_v16 = vpop.f32.mrb[4].mxu1 }
 0x11e   :  { %v290_v17 = vadd.f32 %v289_v15, %v78_v61  ;;  %v310_v18 = vadd.f32 %v309_v16, %v78_v61  ;;  %v291_v19 = vpop.f32.mrb[5].mxu0  ;;  %v311_v20 = vpop.f32.mrb[5].mxu1 }
 0x11f   :  { %v292_v21 = vadd.f32 %v291_v19, %v82_v62  ;;  %v312_v22 = vadd.f32 %v311_v20, %v82_v62  ;;  %v293_v23 = vpop.f32.mrb[6].mxu0  ;;  %v313_v24 = vpop.f32.mrb[6].mxu1 }
 0x120   :  { %322 = vst [vmem:[%s674_s4 + $0x20] sm:$0xff] %v290_v17  ;;  %330 = vst [vmem:[%s674_s4 + $0x60] sm:$0xff] %v310_v18  ;;  %v294_v25 = vadd.f32 %v293_v23, %v78_v61  ;;  %v314_v26 = vadd.f32 %v313_v24, %v78_v61  ;;  %v295_v27 = vpop.f32.mrb[7].mxu0  ;;  %v315_v28 = vpop.f32.mrb[7].mxu1 }
 0x121   :  { %323 = vst [vmem:[%s674_s4 + $0x28] sm:$0xff] %v292_v21  ;;  %331 = vst [vmem:[%s674_s4 + $0x68] sm:$0xff] %v312_v22  ;;  %v296_v29 = vadd.f32 %v295_v27, %v82_v62  ;;  %v316_v30 = vadd.f32 %v315_v28, %v82_v62 }
 0x122   :  { %324 = vst [vmem:[%s674_s4 + $0x30] sm:$0xff] %v294_v25  ;;  %332 = vst [vmem:[%s674_s4 + $0x70] sm:$0xff] %v314_v26 }
 0x123   :  { %325 = vst [vmem:[%s674_s4 + $0x38] sm:$0xff] %v296_v29  ;;  %333 = vst [vmem:[%s674_s4 + $0x78] sm:$0xff] %v316_v30 }

// kernel: attn_rnn_enc_forward.4
= control target key start
LH: loop header
LB: loop body
LE: loop exit
PB: predicated region body
PF: predicated region fallthrough
CT: control target
= control target key end

     0   :  { %12 = vsyncpa [#allocation3], 0  ;;  %s753_s24 = smov [#allocation2]   ;;  %s950_s0 = inlined_call_operand.vmem [shape: bf16[64,128], index: 0, kind: input, shape index: {}]   ;;  %s951_s1 = inlined_call_operand.vmem [shape: bf16[128,128], index: 1, kind: input, shape index: {}]   ;;  %s952_s2 = inlined_call_operand.vmem [shape: f32[1,128], index: 2, kind: input, shape index: {}]   ;;  %s953_s3 = inlined_call_operand.hbm [shape: bf16[128,128], index: 3, kind: input, shape index: {}]   ;;  %s954_s4 = inlined_call_operand.vmem [shape: f32[1,128], index: 4, kind: input, shape index: {}]   ;;  %s955_s5 = inlined_call_operand.vmem [shape: bf16[128,256], index: 5, kind: input, shape index: {}]   ;;  %s956_s6 = inlined_call_operand.vmem [shape: f32[1,256], index: 6, kind: input, shape index: {}]   ;;  %s957_s7 = inlined_call_operand.vmem [shape: f32[64,256], index: 7, kind: output, shape index: {}]  }
   0x1   :  { %s24_s25 = sshll.u32 %s753_s24, 4  ;;  %s729_s28 = scalar_lea.hbm %s953_s3, 1024  ;;  %s25_s25 = int_to_ptr.vmem [resolvable:$true] %s24_s25 }
   0x2   :  { %p730_p0 = scmp.ne.s32.totalorder %s953_s3, %s729_s28  ;;  %p733_p1 = scmp.lt.u32.totalorder %s729_s28, %s953_s3 }
   0x4   :  { %p735_p2 = pnand %p733_p1, %p730_p0 }
   0x6   :  { %738 = shalt.err (!%p735_p2)
}
   0x7   :  { %s739_s10 = scalar_lea.vmem %s25_s25, 1024  ;;  %p744_p4 = scmp.lt.s32.totalorder %s25_s25, %s25_s25 }
   0x8   :  { %p740_p3 = scmp.ne.s32.totalorder %s25_s25, %s739_s10  ;;  %p745_p5 = scmp.lt.s32.totalorder %s739_s10, %s739_s10 }
   0xa   :  { %p746_p6 = por %p745_p5, %p744_p4 }
   0xc   :  { %p747_p7 = pnand %p746_p6, %p740_p3 }
   0xe   :  { %750 = shalt.err (!%p747_p7)
}
   0xf   :  { %s754_s11 = smov 64   ;;  %s755_s12 = smov 4  }
  0x10   :  { %30 = dma.hbm_to_vmem [thread:$0]  %s953_s3, 1024, %s25_s25, [#allocation3], %s754_s11, %s754_s11, %s755_s12  }
  0x11   :  { %751 = dma.done.wait [#allocation3], 1024  }
  0x12   :  { %752 = vsyncadd [#allocation3], 4294966272  ;;  %v685_v0 = vld [vmem:[%s951_s1] sm:$0xff]   ;;  %v686_v1 = vld [vmem:[%s951_s1 + $0x8] sm:$0xff]  }
  0x13   :  { %633 = vmatprep.subr.bf16.mxu1 %v685_v0  ;;  %v687_v2 = vld [vmem:[%s951_s1 + $0x10] sm:$0xff]   ;;  %v688_v3 = vld [vmem:[%s951_s1 + $0x18] sm:$0xff]   ;;  %v693_v4 = vld [vmem:[%s950_s0] sm:$0xff]  }
  0x14   :  { %634 = vmatpush3.bf16.msra.mxu1 %v685_v0  ;;  %649 = vmatprep.mubr.bf16.mxu1 %v693_v4  ;;  %v689_v5 = vld [vmem:[%s951_s1 + $0x20] sm:$0xff]   ;;  %v690_v6 = vld [vmem:[%s951_s1 + $0x28] sm:$0xff]   ;;  %v691_v7 = vld [vmem:[%s951_s1 + $0x30] sm:$0xff]  }
  0x15   :  { %635 = vmatprep.subr.bf16.mxu1 %v686_v1  ;;  %v692_v8 = vld [vmem:[%s951_s1 + $0x38] sm:$0xff]   ;;  %v697_v9 = vld [vmem:[#allocation2] sm:$0xff]   ;;  %v694_v10 = vld [vmem:[%s950_s0 + $0x8] sm:$0xff]  }
  0x16   :  { %v695_v11 = vld [vmem:[%s950_s0 + $0x10] sm:$0xff]   ;;  %v698_v12 = vld [vmem:[#allocation2 + $0x8] sm:$0xff]   ;;  %v696_v14 = vld [vmem:[%s950_s0 + $0x18] sm:$0xff]  }
  0x17   :  { %v699_v13 = vld [vmem:[#allocation2 + $0x10] sm:$0xff]   ;;  %v700_v15 = vld [vmem:[#allocation2 + $0x18] sm:$0xff]   ;;  %v701_v16 = vld [vmem:[#allocation2 + $0x20] sm:$0xff]  }
  0x18   :  { %636 = vmatpush3.bf16.msra.mxu1 %v686_v1  ;;  %v702_v17 = vld [vmem:[#allocation2 + $0x28] sm:$0xff]   ;;  %v703_v18 = vld [vmem:[#allocation2 + $0x30] sm:$0xff]   ;;  %v704_v19 = vld [vmem:[#allocation2 + $0x38] sm:$0xff]   ;;  %v756_v1 = vmov 0  }
  0x19   :  { %637 = vmatprep.subr.bf16.mxu1 %v687_v2  ;;  %v705_v20 = vld [vmem:[%s955_s5 + $0x4] ss:$8 sps:$4 sm:$0xff]   ;;  %v707_v21 = vld [vmem:[%s955_s5] ss:$8 sps:$4 sm:$0xff]   ;;  %v708_v22 = vld [vmem:[%s955_s5 + $0x14] ss:$8 sps:$4 sm:$0xff]   ;;  %509 = vmatprep.mubr.bf16.mxu0 %v756_v1 }
  0x1a   :  { %477 = vmatprep.subr.bf16.mxu0 %v705_v20  ;;  %v710_v23 = vld [vmem:[%s955_s5 + $0x10] ss:$8 sps:$4 sm:$0xff]   ;;  %v711_v24 = vld [vmem:[%s955_s5 + $0x24] ss:$8 sps:$4 sm:$0xff]   ;;  %v713_v25 = vld [vmem:[%s955_s5 + $0x20] ss:$8 sps:$4 sm:$0xff]  }
  0x1b   :  { %478 = vmatpush1.bf16.msra.mxu0 %v707_v21  ;;  %v714_v26 = vld [vmem:[%s955_s5 + $0x34] ss:$8 sps:$4 sm:$0xff]   ;;  %v716_v27 = vld [vmem:[%s955_s5 + $0x30] ss:$8 sps:$4 sm:$0xff]   ;;  %v717_v28 = vld [vmem:[%s955_s5 + $0x44] ss:$8 sps:$4 sm:$0xff]  }
  0x1c   :  { %638 = vmatpush3.bf16.msra.mxu1 %v687_v2  ;;  %479 = vmatprep.subr.bf16.mxu0 %v708_v22  ;;  %v719_v29 = vld [vmem:[%s955_s5 + $0x40] ss:$8 sps:$4 sm:$0xff]   ;;  %v720_v30 = vld [vmem:[%s955_s5 + $0x54] ss:$8 sps:$4 sm:$0xff]   ;;  %v722_v31 = vld [vmem:[%s955_s5 + $0x50] ss:$8 sps:$4 sm:$0xff]  }
  0x1d   :  { %639 = vmatprep.subr.bf16.mxu1 %v688_v3  ;;  %v571_v32 = vld [vmem:[%s952_s2] ss:$0 sm:$0xff]  ;;  %v723_v61 = vld [vmem:[%s955_s5 + $0x64] ss:$8 sps:$4 sm:$0xff]   ;;  %v726_v63 = vld [vmem:[%s955_s5 + $0x74] ss:$8 sps:$4 sm:$0xff]  }
  0x1e   :  { %v725_v62 = vld [vmem:[%s955_s5 + $0x60] ss:$8 sps:$4 sm:$0xff]   ;;  %v728_v0 = vld [vmem:[%s955_s5 + $0x70] ss:$8 sps:$4 sm:$0xff]  }
  0x1f   :  { %480 = vmatpush1.bf16.msra.mxu0 %v710_v23  ;;  %v584_v2 = vld [vmem:[%s954_s4] ss:$0 sm:$0xff] }
  0x20   :  { %640 = vmatpush3.bf16.msra.mxu1 %v688_v3  ;;  %481 = vmatprep.subr.bf16.mxu0 %v711_v24 }
  0x21   :  { %641 = vmatprep.subr.bf16.mxu1 %v689_v5 }
  0x23   :  { %482 = vmatpush1.bf16.msra.mxu0 %v713_v25 }
  0x24   :  { %642 = vmatpush3.bf16.msra.mxu1 %v689_v5  ;;  %483 = vmatprep.subr.bf16.mxu0 %v714_v26 }
  0x25   :  { %643 = vmatprep.subr.bf16.mxu1 %v690_v6 }
  0x27   :  { %484 = vmatpush1.bf16.msra.mxu0 %v716_v27 }
  0x28   :  { %644 = vmatpush3.bf16.msra.mxu1 %v690_v6  ;;  %485 = vmatprep.subr.bf16.mxu0 %v717_v28 }
  0x29   :  { %645 = vmatprep.subr.bf16.mxu1 %v691_v7 }
  0x2b   :  { %486 = vmatpush1.bf16.msra.mxu0 %v719_v29 }
  0x2c   :  { %646 = vmatpush3.bf16.msra.mxu1 %v691_v7  ;;  %487 = vmatprep.subr.bf16.mxu0 %v720_v30 }
  0x2d   :  { %647 = vmatprep.subr.bf16.mxu1 %v692_v8 }
  0x2f   :  { %488 = vmatpush1.bf16.msra.mxu0 %v722_v31  ;;  %v387_v31 = vlaneseq }
  0x30   :  { %648 = vmatpush3.bf16.msra.mxu1 %v692_v8  ;;  %489 = vmatprep.subr.bf16.mxu0 %v723_v61 }
  0x31   :  { %657 = vmatprep.subr.bf16.mxu1 %v697_v9 }
  0x33   :  { %650 = vmatmul.mubr.bf16.vlgmr.msra.gmra.mrb[0].mxu1 %v694_v10  ;;  %490 = vmatpush1.bf16.msra.mxu0 %v725_v62 }
  0x34   :  { %653 = vmatprep.mubr.bf16.mxu1 %v695_v11  ;;  %658 = vmatpush3.bf16.msra.mxu1 %v697_v9 }
  0x35   :  { %659 = vmatprep.subr.bf16.mxu1 %v698_v12  ;;  %491 = vmatprep.subr.bf16.mxu0 %v726_v63 }
  0x37   :  { %492 = vmatpush1.bf16.msra.mxu0 %v728_v0 }
  0x38   :  { %660 = vmatpush3.bf16.msra.mxu1 %v698_v12 }
  0x39   :  { %661 = vmatprep.subr.bf16.mxu1 %v699_v13 }
  0x3b   :  { %654 = vmatmul.mubr.bf16.gmra.mrb[4].mxu1 %v696_v14 }
  0x3c   :  { %662 = vmatpush3.bf16.msra.mxu1 %v699_v13 }
  0x3d   :  { %663 = vmatprep.subr.bf16.mxu1 %v700_v15 }
  0x40   :  { %664 = vmatpush3.bf16.msra.mxu1 %v700_v15 }
  0x41   :  { %665 = vmatprep.subr.bf16.mxu1 %v701_v16 }
  0x44   :  { %666 = vmatpush3.bf16.msra.mxu1 %v701_v16 }
  0x45   :  { %667 = vmatprep.subr.bf16.mxu1 %v702_v17 }
  0x48   :  { %668 = vmatpush3.bf16.msra.mxu1 %v702_v17 }
  0x49   :  { %669 = vmatprep.subr.bf16.mxu1 %v703_v18 }
  0x4c   :  { %670 = vmatpush3.bf16.msra.mxu1 %v703_v18 }
  0x4d   :  { %671 = vmatprep.subr.bf16.mxu1 %v704_v19 }
  0x50   :  { %672 = vmatpush3.bf16.msra.mxu1 %v704_v19 }
 0x106   :  { %v651_v33 = vpop.f32.mrb[0].mxu1 }
 0x107   :  { %v187_v34 = vadd.f32 %v651_v33, %v571_v32  ;;  %v178_v35 = vpop.f32.mrb[1].mxu1 }
 0x108   :  { %v179_v36 = vadd.f32 %v571_v32, %v178_v35  ;;  %v652_v37 = vpop.f32.mrb[2].mxu1 }
 0x109   :  { %v190_v38 = vadd.f32 %v652_v37, %v571_v32  ;;  %v181_v39 = vpop.f32.mrb[3].mxu1  ;;  %v211_v41 = vmax.f32 %v187_v34, 0.0  ;;  %v385_v34 = vld [vmem:[%s956_s6] sm:$0x3] }
 0x10a   :  { %v182_v40 = vadd.f32 %v571_v32, %v181_v39  ;;  %v209_v43 = vmax.f32 %v179_v36, 0.0 }
 0x10b   :  { %v212_v42 = vmax.f32 %v190_v38, 0.0 }
 0x10c   :  { %v210_v44 = vmax.f32 %v182_v40, 0.0 }
 0x10d   :  { %v218_v45 = vpack.c.bf16 %v212_v42, %v211_v41 }
 0x10e   :  { %v217_v46 = vpack.c.bf16 %v210_v44, %v209_v43  ;;  %v655_v47 = vpop.f32.mrb[4].mxu1 }
 0x10f   :  { %v203_v48 = vadd.f32 %v655_v47, %v571_v32  ;;  %v194_v49 = vpop.f32.mrb[5].mxu1 }
 0x110   :  { %v195_v50 = vadd.f32 %v571_v32, %v194_v49  ;;  %673 = vmatprep.mubr.bf16.mxu1 %v217_v46  ;;  %v656_v51 = vpop.f32.mrb[6].mxu1 }
 0x111   :  { %v215_v52 = vmax.f32 %v203_v48, 0.0  ;;  %v206_v53 = vadd.f32 %v656_v51, %v571_v32  ;;  %674 = vmatmul.mubr.bf16.vlgmr.msra.gmra.mrb[8].mxu1 %v218_v45  ;;  %v197_v54 = vpop.f32.mrb[7].mxu1 }
 0x112   :  { %v213_v55 = vmax.f32 %v195_v50, 0.0  ;;  %v198_v56 = vadd.f32 %v571_v32, %v197_v54  ;;  %v388_v32 = vshrl.u32 %v387_v31, 7 }
 0x113   :  { %v216_v57 = vmax.f32 %v206_v53, 0.0 }
 0x114   :  { %v214_v58 = vmax.f32 %v198_v56, 0.0  ;;  %v389_v33 = vsub.s32 0, %v388_v32  ;;  %v393_v35 = vsub.s32 1, %v388_v32 }
 0x115   :  { %v220_v59 = vpack.c.bf16 %v216_v57, %v215_v52 }
 0x116   :  { %v219_v60 = vpack.c.bf16 %v214_v58, %v213_v55  ;;  %v390_v36 = vrot.slane %v385_v34, %v389_v33  ;;  %v394_v37 = vrot.slane %v385_v34, %v393_v35 }
 0x118   :  { %677 = vmatprep.mubr.bf16.mxu1 %v219_v60 }
 0x119   :  { %678 = vmatmul.mubr.bf16.gmra.mrb[12].mxu1 %v220_v59 }
 0x1e4   :  { %v675_v3 = vpop.f32.mrb[8].mxu1 }
 0x1e5   :  { %v335_v4 = vadd.f32 %v675_v3, %v584_v2  ;;  %v326_v5 = vpop.f32.mrb[9].mxu1 }
 0x1e6   :  { %v327_v6 = vadd.f32 %v584_v2, %v326_v5  ;;  %v676_v7 = vpop.f32.mrb[10].mxu1 }
 0x1e7   :  { %v338_v8 = vadd.f32 %v676_v7, %v584_v2  ;;  %v329_v9 = vpop.f32.mrb[11].mxu1  ;;  %v359_v11 = vmax.f32 %v335_v4, 0.0 }
 0x1e8   :  { %v330_v10 = vadd.f32 %v584_v2, %v329_v9  ;;  %v357_v13 = vmax.f32 %v327_v6, 0.0 }
 0x1e9   :  { %v360_v12 = vmax.f32 %v338_v8, 0.0 }
 0x1ea   :  { %v358_v14 = vmax.f32 %v330_v10, 0.0 }
 0x1eb   :  { %v366_v15 = vpack.c.bf16 %v360_v12, %v359_v11 }
 0x1ec   :  { %v365_v16 = vpack.c.bf16 %v358_v14, %v357_v13  ;;  %v679_v17 = vpop.f32.mrb[12].mxu1 }
 0x1ed   :  { %v351_v18 = vadd.f32 %v679_v17, %v584_v2  ;;  %v342_v19 = vpop.f32.mrb[13].mxu1 }
 0x1ee   :  { %v343_v20 = vadd.f32 %v584_v2, %v342_v19  ;;  %510 = vmatmul.mubr.bf16.vlgmr.msra.gmra.mrb[0].mxu0 %v365_v16  ;;  %v680_v21 = vpop.f32.mrb[14].mxu1 }
 0x1ef   :  { %v363_v22 = vmax.f32 %v351_v18, 0.0  ;;  %v354_v23 = vadd.f32 %v680_v21, %v584_v2  ;;  %v345_v24 = vpop.f32.mrb[15].mxu1  ;;  %519 = vmatprep.mubr.bf16.mxu0 %v756_v1 }
 0x1f0   :  { %v361_v25 = vmax.f32 %v343_v20, 0.0  ;;  %v346_v26 = vadd.f32 %v584_v2, %v345_v24 }
 0x1f1   :  { %v364_v27 = vmax.f32 %v354_v23, 0.0 }
 0x1f2   :  { %v362_v28 = vmax.f32 %v346_v26, 0.0 }
 0x1f3   :  { %v368_v29 = vpack.c.bf16 %v364_v27, %v363_v22 }
 0x1f4   :  { %v367_v30 = vpack.c.bf16 %v362_v28, %v361_v25 }
 0x1f6   :  { %520 = vmatmul.mubr.bf16.gmra.mrb[4].mxu0 %v366_v15 }
 0x1f7   :  { %529 = vmatprep.mubr.bf16.mxu0 %v756_v1 }
 0x1fe   :  { %530 = vmatmul.mubr.bf16.gmra.mrb[8].mxu0 %v367_v30 }
 0x1ff   :  { %539 = vmatprep.mubr.bf16.mxu0 %v756_v1 }
 0x206   :  { %540 = vmatmul.mubr.bf16.gmra.mrb[12].mxu0 %v368_v29 }
 0x2c1   :  { %v511_v38 = vpop.f32.mrb[0].mxu0 }
 0x2c2   :  { %v512_v39 = vadd.f32 %v511_v38, %v390_v36  ;;  %v513_v40 = vpop.f32.mrb[1].mxu0 }
 0x2c3   :  { %v514_v41 = vadd.f32 %v513_v40, %v394_v37  ;;  %v515_v42 = vpop.f32.mrb[2].mxu0 }
 0x2c4   :  { %550 = vst [vmem:[%s957_s7] sm:$0xff] %v512_v39  ;;  %v516_v43 = vadd.f32 %v515_v42, %v390_v36  ;;  %v517_v44 = vpop.f32.mrb[3].mxu0 }
 0x2c5   :  { %551 = vst [vmem:[%s957_s7 + $0x8] sm:$0xff] %v514_v41  ;;  %v518_v45 = vadd.f32 %v517_v44, %v394_v37 }
 0x2c6   :  { %552 = vst [vmem:[%s957_s7 + $0x10] sm:$0xff] %v516_v43 }
 0x2c7   :  { %553 = vst [vmem:[%s957_s7 + $0x18] sm:$0xff] %v518_v45 }
 0x2c9   :  { %v521_v46 = vpop.f32.mrb[4].mxu0 }
 0x2ca   :  { %v522_v47 = vadd.f32 %v521_v46, %v390_v36  ;;  %v523_v48 = vpop.f32.mrb[5].mxu0 }
 0x2cb   :  { %v524_v49 = vadd.f32 %v523_v48, %v394_v37  ;;  %v525_v50 = vpop.f32.mrb[6].mxu0 }
 0x2cc   :  { %554 = vst [vmem:[%s957_s7 + $0x20] sm:$0xff] %v522_v47  ;;  %v526_v51 = vadd.f32 %v525_v50, %v390_v36  ;;  %v527_v52 = vpop.f32.mrb[7].mxu0 }
 0x2cd   :  { %555 = vst [vmem:[%s957_s7 + $0x28] sm:$0xff] %v524_v49  ;;  %v528_v53 = vadd.f32 %v527_v52, %v394_v37 }
 0x2ce   :  { %556 = vst [vmem:[%s957_s7 + $0x30] sm:$0xff] %v526_v51 }
 0x2cf   :  { %557 = vst [vmem:[%s957_s7 + $0x38] sm:$0xff] %v528_v53 }
 0x2d1   :  { %v531_v54 = vpop.f32.mrb[8].mxu0 }
 0x2d2   :  { %v532_v55 = vadd.f32 %v531_v54, %v390_v36  ;;  %v533_v56 = vpop.f32.mrb[9].mxu0 }
 0x2d3   :  { %v534_v57 = vadd.f32 %v533_v56, %v394_v37  ;;  %v535_v58 = vpop.f32.mrb[10].mxu0 }
 0x2d4   :  { %558 = vst [vmem:[%s957_s7 + $0x40] sm:$0xff] %v532_v55  ;;  %v536_v59 = vadd.f32 %v535_v58, %v390_v36  ;;  %v537_v60 = vpop.f32.mrb[11].mxu0 }
 0x2d5   :  { %559 = vst [vmem:[%s957_s7 + $0x48] sm:$0xff] %v534_v57  ;;  %v538_v61 = vadd.f32 %v537_v60, %v394_v37 }
 0x2d6   :  { %560 = vst [vmem:[%s957_s7 + $0x50] sm:$0xff] %v536_v59 }
 0x2d7   :  { %561 = vst [vmem:[%s957_s7 + $0x58] sm:$0xff] %v538_v61 }
 0x2d9   :  { %v541_v62 = vpop.f32.mrb[12].mxu0 }
 0x2da   :  { %v542_v63 = vadd.f32 %v541_v62, %v390_v36  ;;  %v543_v0 = vpop.f32.mrb[13].mxu0 }
 0x2db   :  { %v544_v1 = vadd.f32 %v543_v0, %v394_v37  ;;  %v545_v2 = vpop.f32.mrb[14].mxu0 }
 0x2dc   :  { %562 = vst [vmem:[%s957_s7 + $0x60] sm:$0xff] %v542_v63  ;;  %v546_v3 = vadd.f32 %v545_v2, %v390_v36  ;;  %v547_v4 = vpop.f32.mrb[15].mxu0 }
 0x2dd   :  { %563 = vst [vmem:[%s957_s7 + $0x68] sm:$0xff] %v544_v1  ;;  %v548_v5 = vadd.f32 %v547_v4, %v394_v37 }
 0x2de   :  { %564 = vst [vmem:[%s957_s7 + $0x70] sm:$0xff] %v546_v3 }
 0x2df   :  { %565 = vst [vmem:[%s957_s7 + $0x78] sm:$0xff] %v548_v5 }
 0x2e0   :  { %570 = vsyncpa [#allocation3], 1 }

// kernel: attn_rnn_enc_forward.5
= control target key start
LH: loop header
LB: loop body
LE: loop exit
PB: predicated region body
PF: predicated region fallthrough
CT: control target
= control target key end

     0   :  { %v977_v2 = vmov 0.0|0.0   ;;  %s1517_s0 = inlined_call_operand.vmem [shape: f32[8,8,256], index: 0, kind: input, shape index: {}, may-alias: {0,1}]   ;;  %s1518_s1 = inlined_call_operand.vmem [shape: f32[8,8,256], index: 1, kind: input, shape index: {}, may-alias: {0,1}]   ;;  %s1519_s2 = inlined_call_operand.vmem [shape: bf16[256,256], index: 2, kind: input, shape index: {}]   ;;  %s1520_s3 = inlined_call_operand.vmem [shape: f32[8,8,128], index: 3, kind: output, shape index: {0}]   ;;  %s1521_s4 = inlined_call_operand.vmem [shape: f32[8,8,128], index: 4, kind: output, shape index: {1}]  }
   0x1   :  { %v1006_v0 = vld [vmem:[%s1519_s2 + $0x4] ss:$8 sps:$4 sm:$0xff]   ;;  %v1011_v1 = vld [vmem:[%s1519_s2] ss:$8 sps:$4 sm:$0xff]   ;;  %399 = vmatprep.mubr.bf16.mxu0 %v977_v2  ;;  %v1018_v3 = vld [vmem:[%s1519_s2 + $0x14] ss:$8 sps:$4 sm:$0xff]  }
   0x2   :  { %367 = vmatprep.subr.bf16.mxu0 %v1006_v0  ;;  %421 = vmatprep.subr.bf16.mxu1 %v1006_v0  ;;  %v1025_v4 = vld [vmem:[%s1519_s2 + $0x10] ss:$8 sps:$4 sm:$0xff]   ;;  %v1032_v5 = vld [vmem:[%s1519_s2 + $0x24] ss:$8 sps:$4 sm:$0xff]   ;;  %v1039_v6 = vld [vmem:[%s1519_s2 + $0x20] ss:$8 sps:$4 sm:$0xff]  }
   0x3   :  { %368 = vmatpush1.bf16.msra.mxu0 %v1011_v1  ;;  %422 = vmatpush1.bf16.msra.mxu1 %v1011_v1  ;;  %v1046_v7 = vld [vmem:[%s1519_s2 + $0x34] ss:$8 sps:$4 sm:$0xff]   ;;  %v1053_v8 = vld [vmem:[%s1519_s2 + $0x30] ss:$8 sps:$4 sm:$0xff]   ;;  %v1060_v9 = vld [vmem:[%s1519_s2 + $0x44] ss:$8 sps:$4 sm:$0xff]  }
   0x4   :  { %369 = vmatprep.subr.bf16.mxu0 %v1018_v3  ;;  %423 = vmatprep.subr.bf16.mxu1 %v1018_v3  ;;  %v1067_v10 = vld [vmem:[%s1519_s2 + $0x40] ss:$8 sps:$4 sm:$0xff]   ;;  %v1074_v11 = vld [vmem:[%s1519_s2 + $0x54] ss:$8 sps:$4 sm:$0xff]   ;;  %v1081_v12 = vld [vmem:[%s1519_s2 + $0x50] ss:$8 sps:$4 sm:$0xff]  }
   0x5   :  { %v1088_v13 = vld [vmem:[%s1519_s2 + $0x64] ss:$8 sps:$4 sm:$0xff]   ;;  %v1095_v14 = vld [vmem:[%s1519_s2 + $0x60] ss:$8 sps:$4 sm:$0xff]   ;;  %v1102_v15 = vld [vmem:[%s1519_s2 + $0x74] ss:$8 sps:$4 sm:$0xff]  }
   0x6   :  { %v1109_v16 = vld [vmem:[%s1519_s2 + $0x70] ss:$8 sps:$4 sm:$0xff]   ;;  %v1116_v17 = vld [vmem:[%s1519_s2 + $0x84] ss:$8 sps:$4 sm:$0xff]   ;;  %v1123_v18 = vld [vmem:[%s1519_s2 + $0x80] ss:$8 sps:$4 sm:$0xff]  }
   0x7   :  { %370 = vmatpush1.bf16.msra.mxu0 %v1025_v4  ;;  %424 = vmatpush1.bf16.msra.mxu1 %v1025_v4  ;;  %v1130_v19 = vld [vmem:[%s1519_s2 + $0x94] ss:$8 sps:$4 sm:$0xff]   ;;  %v1137_v20 = vld [vmem:[%s1519_s2 + $0x90] ss:$8 sps:$4 sm:$0xff]   ;;  %v1144_v21 = vld [vmem:[%s1519_s2 + $0xa4] ss:$8 sps:$4 sm:$0xff]  }
   0x8   :  { %371 = vmatprep.subr.bf16.mxu0 %v1032_v5  ;;  %425 = vmatprep.subr.bf16.mxu1 %v1032_v5  ;;  %v1151_v22 = vld [vmem:[%s1519_s2 + $0xa0] ss:$8 sps:$4 sm:$0xff]   ;;  %v1158_v23 = vld [vmem:[%s1519_s2 + $0xb4] ss:$8 sps:$4 sm:$0xff]   ;;  %v1165_v24 = vld [vmem:[%s1519_s2 + $0xb0] ss:$8 sps:$4 sm:$0xff]  }
   0x9   :  { %v1172_v25 = vld [vmem:[%s1519_s2 + $0xc4] ss:$8 sps:$4 sm:$0xff]   ;;  %v1179_v26 = vld [vmem:[%s1519_s2 + $0xc0] ss:$8 sps:$4 sm:$0xff]   ;;  %v1186_v27 = vld [vmem:[%s1519_s2 + $0xd4] ss:$8 sps:$4 sm:$0xff]  }
   0xa   :  { %v1193_v28 = vld [vmem:[%s1519_s2 + $0xd0] ss:$8 sps:$4 sm:$0xff]   ;;  %v1200_v29 = vld [vmem:[%s1519_s2 + $0xe4] ss:$8 sps:$4 sm:$0xff]   ;;  %v1207_v30 = vld [vmem:[%s1519_s2 + $0xe0] ss:$8 sps:$4 sm:$0xff]  }
   0xb   :  { %372 = vmatpush1.bf16.msra.mxu0 %v1039_v6  ;;  %426 = vmatpush1.bf16.msra.mxu1 %v1039_v6  ;;  %v1214_v31 = vld [vmem:[%s1519_s2 + $0xf4] ss:$8 sps:$4 sm:$0xff]   ;;  %v1221_v32 = vld [vmem:[%s1519_s2 + $0xf0] ss:$8 sps:$4 sm:$0xff]   ;;  %v53_v33 = vld [vmem:[%s1517_s0] sm:$0xff] }
   0xc   :  { %373 = vmatprep.subr.bf16.mxu0 %v1046_v7  ;;  %427 = vmatprep.subr.bf16.mxu1 %v1046_v7  ;;  %v849_v34 = vld [vmem:[%s1518_s1 + $0x78] sm:$0xff]  ;;  %v55_v45 = vld [vmem:[%s1517_s0 + $0x10] sm:$0xff]  ;;  %v848_v46 = vld [vmem:[%s1518_s1 + $0x68] sm:$0xff] }
   0xd   :  { %v57_v57 = vld [vmem:[%s1517_s0 + $0x20] sm:$0xff]  ;;  %v847_v58 = vld [vmem:[%s1518_s1 + $0x58] sm:$0xff] }
   0xf   :  { %374 = vmatpush1.bf16.msra.mxu0 %v1053_v8  ;;  %428 = vmatpush1.bf16.msra.mxu1 %v1053_v8 }
  0x10   :  { %375 = vmatprep.subr.bf16.mxu0 %v1060_v9  ;;  %429 = vmatprep.subr.bf16.mxu1 %v1060_v9 }
  0x13   :  { %376 = vmatpush1.bf16.msra.mxu0 %v1067_v10  ;;  %430 = vmatpush1.bf16.msra.mxu1 %v1067_v10 }
  0x14   :  { %377 = vmatprep.subr.bf16.mxu0 %v1074_v11  ;;  %431 = vmatprep.subr.bf16.mxu1 %v1074_v11 }
  0x17   :  { %378 = vmatpush1.bf16.msra.mxu0 %v1081_v12  ;;  %432 = vmatpush1.bf16.msra.mxu1 %v1081_v12 }
  0x18   :  { %379 = vmatprep.subr.bf16.mxu0 %v1088_v13  ;;  %433 = vmatprep.subr.bf16.mxu1 %v1088_v13 }
  0x1b   :  { %380 = vmatpush1.bf16.msra.mxu0 %v1095_v14  ;;  %434 = vmatpush1.bf16.msra.mxu1 %v1095_v14 }
  0x1c   :  { %381 = vmatprep.subr.bf16.mxu0 %v1102_v15  ;;  %435 = vmatprep.subr.bf16.mxu1 %v1102_v15 }
  0x1f   :  { %382 = vmatpush1.bf16.msra.mxu0 %v1109_v16  ;;  %436 = vmatpush1.bf16.msra.mxu1 %v1109_v16 }
  0x20   :  { %383 = vmatprep.subr.bf16.mxu0 %v1116_v17  ;;  %437 = vmatprep.subr.bf16.mxu1 %v1116_v17 }
  0x23   :  { %384 = vmatpush1.bf16.msra.mxu0 %v1123_v18  ;;  %438 = vmatpush1.bf16.msra.mxu1 %v1123_v18 }
  0x24   :  { %385 = vmatprep.subr.bf16.mxu0 %v1130_v19  ;;  %439 = vmatprep.subr.bf16.mxu1 %v1130_v19 }
  0x27   :  { %386 = vmatpush1.bf16.msra.mxu0 %v1137_v20  ;;  %440 = vmatpush1.bf16.msra.mxu1 %v1137_v20 }
  0x28   :  { %387 = vmatprep.subr.bf16.mxu0 %v1144_v21  ;;  %441 = vmatprep.subr.bf16.mxu1 %v1144_v21 }
  0x2b   :  { %388 = vmatpush1.bf16.msra.mxu0 %v1151_v22  ;;  %442 = vmatpush1.bf16.msra.mxu1 %v1151_v22 }
  0x2c   :  { %389 = vmatprep.subr.bf16.mxu0 %v1158_v23  ;;  %443 = vmatprep.subr.bf16.mxu1 %v1158_v23 }
  0x2f   :  { %390 = vmatpush1.bf16.msra.mxu0 %v1165_v24  ;;  %444 = vmatpush1.bf16.msra.mxu1 %v1165_v24 }
  0x30   :  { %391 = vmatprep.subr.bf16.mxu0 %v1172_v25  ;;  %445 = vmatprep.subr.bf16.mxu1 %v1172_v25 }
  0x33   :  { %392 = vmatpush1.bf16.msra.mxu0 %v1179_v26  ;;  %446 = vmatpush1.bf16.msra.mxu1 %v1179_v26 }
  0x34   :  { %393 = vmatprep.subr.bf16.mxu0 %v1186_v27  ;;  %447 = vmatprep.subr.bf16.mxu1 %v1186_v27 }
  0x37   :  { %394 = vmatpush1.bf16.msra.mxu0 %v1193_v28  ;;  %448 = vmatpush1.bf16.msra.mxu1 %v1193_v28 }
  0x38   :  { %395 = vmatprep.subr.bf16.mxu0 %v1200_v29  ;;  %449 = vmatprep.subr.bf16.mxu1 %v1200_v29 }
  0x3b   :  { %396 = vmatpush1.bf16.msra.mxu0 %v1207_v30  ;;  %450 = vmatpush1.bf16.msra.mxu1 %v1207_v30 }
  0x3c   :  { %397 = vmatprep.subr.bf16.mxu0 %v1214_v31  ;;  %451 = vmatprep.subr.bf16.mxu1 %v1214_v31 }
  0x3f   :  { %398 = vmatpush1.bf16.msra.mxu0 %v1221_v32  ;;  %452 = vmatpush1.bf16.msra.mxu1 %v1221_v32 }
  0x40   :  { %476 = vmatprep.subr.bf16.mxu0 %v1006_v0  ;;  %531 = vmatprep.subr.bf16.mxu1 %v1006_v0 }
  0x42   :  { %400 = vmatmul.mubr.bf16.vlgmr.msra.gmra.mrb[0].mxu0 %v977_v2 }
  0x43   :  { %477 = vmatpush1.bf16.msra.mxu0 %v1011_v1 }
  0x44   :  { %478 = vmatprep.subr.bf16.mxu0 %v1018_v3 }
  0x47   :  { %479 = vmatpush1.bf16.msra.mxu0 %v1025_v4 }
  0x48   :  { %480 = vmatprep.subr.bf16.mxu0 %v1032_v5 }
  0x4b   :  { %481 = vmatpush1.bf16.msra.mxu0 %v1039_v6 }
  0x4c   :  { %482 = vmatprep.subr.bf16.mxu0 %v1046_v7 }
  0x4f   :  { %483 = vmatpush1.bf16.msra.mxu0 %v1053_v8 }
  0x50   :  { %484 = vmatprep.subr.bf16.mxu0 %v1060_v9 }
  0x53   :  { %485 = vmatpush1.bf16.msra.mxu0 %v1067_v10 }
  0x54   :  { %486 = vmatprep.subr.bf16.mxu0 %v1074_v11 }
  0x57   :  { %487 = vmatpush1.bf16.msra.mxu0 %v1081_v12 }
  0x58   :  { %488 = vmatprep.subr.bf16.mxu0 %v1088_v13 }
  0x5b   :  { %489 = vmatpush1.bf16.msra.mxu0 %v1095_v14 }
  0x5c   :  { %490 = vmatprep.subr.bf16.mxu0 %v1102_v15 }
  0x5f   :  { %491 = vmatpush1.bf16.msra.mxu0 %v1109_v16 }
  0x60   :  { %492 = vmatprep.subr.bf16.mxu0 %v1116_v17 }
  0x63   :  { %493 = vmatpush1.bf16.msra.mxu0 %v1123_v18 }
  0x64   :  { %494 = vmatprep.subr.bf16.mxu0 %v1130_v19 }
  0x67   :  { %495 = vmatpush1.bf16.msra.mxu0 %v1137_v20 }
  0x68   :  { %496 = vmatprep.subr.bf16.mxu0 %v1144_v21 }
  0x6b   :  { %497 = vmatpush1.bf16.msra.mxu0 %v1151_v22 }
  0x6c   :  { %498 = vmatprep.subr.bf16.mxu0 %v1158_v23 }
  0x6f   :  { %499 = vmatpush1.bf16.msra.mxu0 %v1165_v24 }
  0x70   :  { %500 = vmatprep.subr.bf16.mxu0 %v1172_v25 }
  0x73   :  { %501 = vmatpush1.bf16.msra.mxu0 %v1179_v26 }
  0x74   :  { %502 = vmatprep.subr.bf16.mxu0 %v1186_v27 }
  0x77   :  { %503 = vmatpush1.bf16.msra.mxu0 %v1193_v28 }
  0x78   :  { %504 = vmatprep.subr.bf16.mxu0 %v1200_v29 }
  0x7b   :  { %505 = vmatpush1.bf16.msra.mxu0 %v1207_v30 }
  0x7c   :  { %506 = vmatprep.subr.bf16.mxu0 %v1214_v31 }
  0x7f   :  { %507 = vmatpush1.bf16.msra.mxu0 %v1221_v32 }
  0x80   :  { %586 = vmatprep.subr.bf16.mxu0 %v1006_v0 }
 0x115   :  { %v401_v35 = vpop.f32.mrb[0].mxu0 }
 0x116   :  { %v408_v36 = vadd.f32 %v401_v35, %v53_v33  ;;  %v403_v37 = vpop.f32.mrb[1].mxu0 }
 0x117   :  { %v409_v38 = vadd.f32 %v849_v34, %v403_v37  ;;  %v405_v39 = vpop.f32.mrb[2].mxu0  ;;  %v59_v37 = vld [vmem:[%s1517_s0 + $0x30] sm:$0xff] }
 0x118   :  { %945 = vtanh.f32 %v408_v36  ;;  %v406_v40 = vpop.f32.mrb[3].mxu0 }
 0x119   :  { %947 = vtanh.f32 %v409_v38  ;;  %v846_v38 = vld [vmem:[%s1518_s1 + $0x48] sm:$0xff] }
 0x122   :  { %v946_v41 = vpop.eup %945 }
 0x123   :  { %v948_v42 = vpop.eup %947  ;;  %412 = vst [vmem:[%s1520_s3] sm:$0xff] %v946_v41  ;;  %v419_v44 = vpack.c.bf16 %v946_v41, %v946_v41 }
 0x124   :  { %882 = vst [vmem:[%s1521_s4 + $0x38] sm:$0xff] %v948_v42  ;;  %v420_v43 = vpack.c.bf16 %v948_v42, %v948_v42 }
 0x126   :  { %453 = vmatprep.mubr.bf16.mxu1 %v420_v43 }
 0x127   :  { %454 = vmatmul.mubr.bf16.vlgmr.msra.gmra.mrb[0].mxu1 %v419_v44 }
 0x128   :  { %532 = vmatpush1.bf16.msra.mxu1 %v1011_v1 }
 0x129   :  { %533 = vmatprep.subr.bf16.mxu1 %v1018_v3 }
 0x12c   :  { %534 = vmatpush1.bf16.msra.mxu1 %v1025_v4 }
 0x12d   :  { %535 = vmatprep.subr.bf16.mxu1 %v1032_v5 }
 0x130   :  { %536 = vmatpush1.bf16.msra.mxu1 %v1039_v6 }
 0x131   :  { %537 = vmatprep.subr.bf16.mxu1 %v1046_v7 }
 0x134   :  { %538 = vmatpush1.bf16.msra.mxu1 %v1053_v8 }
 0x135   :  { %539 = vmatprep.subr.bf16.mxu1 %v1060_v9 }
 0x138   :  { %540 = vmatpush1.bf16.msra.mxu1 %v1067_v10 }
 0x139   :  { %541 = vmatprep.subr.bf16.mxu1 %v1074_v11 }
 0x13c   :  { %542 = vmatpush1.bf16.msra.mxu1 %v1081_v12 }
 0x13d   :  { %543 = vmatprep.subr.bf16.mxu1 %v1088_v13 }
 0x140   :  { %544 = vmatpush1.bf16.msra.mxu1 %v1095_v14 }
 0x141   :  { %545 = vmatprep.subr.bf16.mxu1 %v1102_v15 }
 0x144   :  { %546 = vmatpush1.bf16.msra.mxu1 %v1109_v16 }
 0x145   :  { %547 = vmatprep.subr.bf16.mxu1 %v1116_v17 }
 0x148   :  { %548 = vmatpush1.bf16.msra.mxu1 %v1123_v18 }
 0x149   :  { %549 = vmatprep.subr.bf16.mxu1 %v1130_v19 }
 0x14c   :  { %550 = vmatpush1.bf16.msra.mxu1 %v1137_v20 }
 0x14d   :  { %551 = vmatprep.subr.bf16.mxu1 %v1144_v21 }
 0x150   :  { %552 = vmatpush1.bf16.msra.mxu1 %v1151_v22 }
 0x151   :  { %553 = vmatprep.subr.bf16.mxu1 %v1158_v23 }
 0x154   :  { %554 = vmatpush1.bf16.msra.mxu1 %v1165_v24 }
 0x155   :  { %555 = vmatprep.subr.bf16.mxu1 %v1172_v25 }
 0x158   :  { %556 = vmatpush1.bf16.msra.mxu1 %v1179_v26 }
 0x159   :  { %557 = vmatprep.subr.bf16.mxu1 %v1186_v27 }
 0x15c   :  { %558 = vmatpush1.bf16.msra.mxu1 %v1193_v28 }
 0x15d   :  { %559 = vmatprep.subr.bf16.mxu1 %v1200_v29 }
 0x160   :  { %560 = vmatpush1.bf16.msra.mxu1 %v1207_v30 }
 0x161   :  { %561 = vmatprep.subr.bf16.mxu1 %v1214_v31 }
 0x164   :  { %562 = vmatpush1.bf16.msra.mxu1 %v1221_v32 }
 0x165   :  { %641 = vmatprep.subr.bf16.mxu1 %v1006_v0 }
 0x1fa   :  { %v455_v47 = vpop.f32.mrb[0].mxu1 }
 0x1fb   :  { %v462_v48 = vadd.f32 %v455_v47, %v55_v45  ;;  %v457_v49 = vpop.f32.mrb[1].mxu1 }
 0x1fc   :  { %v463_v50 = vadd.f32 %v848_v46, %v457_v49  ;;  %v459_v51 = vpop.f32.mrb[2].mxu1  ;;  %v845_v49 = vld [vmem:[%s1518_s1 + $0x38] sm:$0xff] }
 0x1fd   :  { %949 = vtanh.f32 %v462_v48  ;;  %v460_v52 = vpop.f32.mrb[3].mxu1  ;;  %v61_v48 = vld [vmem:[%s1517_s0 + $0x40] sm:$0xff] }
 0x1fe   :  { %951 = vtanh.f32 %v463_v50 }
 0x207   :  { %v950_v53 = vpop.eup %949 }
 0x208   :  { %v952_v54 = vpop.eup %951  ;;  %883 = vst [vmem:[%s1520_s3 + $0x8] sm:$0xff] %v950_v53  ;;  %v474_v56 = vpack.c.bf16 %v950_v53, %v950_v53 }
 0x209   :  { %884 = vst [vmem:[%s1521_s4 + $0x30] sm:$0xff] %v952_v54  ;;  %v475_v55 = vpack.c.bf16 %v952_v54, %v952_v54 }
 0x20b   :  { %508 = vmatprep.mubr.bf16.mxu0 %v475_v55 }
 0x20c   :  { %509 = vmatmul.mubr.bf16.vlgmr.msra.gmra.mrb[4].mxu0 %v474_v56 }
 0x20d   :  { %587 = vmatpush1.bf16.msra.mxu0 %v1011_v1 }
 0x20e   :  { %588 = vmatprep.subr.bf16.mxu0 %v1018_v3 }
 0x211   :  { %589 = vmatpush1.bf16.msra.mxu0 %v1025_v4 }
 0x212   :  { %590 = vmatprep.subr.bf16.mxu0 %v1032_v5 }
 0x215   :  { %591 = vmatpush1.bf16.msra.mxu0 %v1039_v6 }
 0x216   :  { %592 = vmatprep.subr.bf16.mxu0 %v1046_v7 }
 0x219   :  { %593 = vmatpush1.bf16.msra.mxu0 %v1053_v8 }
 0x21a   :  { %594 = vmatprep.subr.bf16.mxu0 %v1060_v9 }
 0x21d   :  { %595 = vmatpush1.bf16.msra.mxu0 %v1067_v10 }
 0x21e   :  { %596 = vmatprep.subr.bf16.mxu0 %v1074_v11 }
 0x221   :  { %597 = vmatpush1.bf16.msra.mxu0 %v1081_v12 }
 0x222   :  { %598 = vmatprep.subr.bf16.mxu0 %v1088_v13 }
 0x225   :  { %599 = vmatpush1.bf16.msra.mxu0 %v1095_v14 }
 0x226   :  { %600 = vmatprep.subr.bf16.mxu0 %v1102_v15 }
 0x229   :  { %601 = vmatpush1.bf16.msra.mxu0 %v1109_v16 }
 0x22a   :  { %602 = vmatprep.subr.bf16.mxu0 %v1116_v17 }
 0x22d   :  { %603 = vmatpush1.bf16.msra.mxu0 %v1123_v18 }
 0x22e   :  { %604 = vmatprep.subr.bf16.mxu0 %v1130_v19 }
 0x231   :  { %605 = vmatpush1.bf16.msra.mxu0 %v1137_v20 }
 0x232   :  { %606 = vmatprep.subr.bf16.mxu0 %v1144_v21 }
 0x235   :  { %607 = vmatpush1.bf16.msra.mxu0 %v1151_v22 }
 0x236   :  { %608 = vmatprep.subr.bf16.mxu0 %v1158_v23 }
 0x239   :  { %609 = vmatpush1.bf16.msra.mxu0 %v1165_v24 }
 0x23a   :  { %610 = vmatprep.subr.bf16.mxu0 %v1172_v25 }
 0x23d   :  { %611 = vmatpush1.bf16.msra.mxu0 %v1179_v26 }
 0x23e   :  { %612 = vmatprep.subr.bf16.mxu0 %v1186_v27 }
 0x241   :  { %613 = vmatpush1.bf16.msra.mxu0 %v1193_v28 }
 0x242   :  { %614 = vmatprep.subr.bf16.mxu0 %v1200_v29 }
 0x245   :  { %615 = vmatpush1.bf16.msra.mxu0 %v1207_v30 }
 0x246   :  { %616 = vmatprep.subr.bf16.mxu0 %v1214_v31 }
 0x249   :  { %617 = vmatpush1.bf16.msra.mxu0 %v1221_v32 }
 0x24a   :  { %696 = vmatprep.subr.bf16.mxu0 %v1006_v0 }
 0x2df   :  { %v510_v59 = vpop.f32.mrb[4].mxu0 }
 0x2e0   :  { %v517_v60 = vadd.f32 %v510_v59, %v57_v57  ;;  %v512_v61 = vpop.f32.mrb[5].mxu0 }
 0x2e1   :  { %v518_v62 = vadd.f32 %v847_v58, %v512_v61  ;;  %v514_v63 = vpop.f32.mrb[6].mxu0 }
 0x2e2   :  { %953 = vtanh.f32 %v517_v60  ;;  %v515_v2 = vpop.f32.mrb[7].mxu0 }
 0x2e3   :  { %955 = vtanh.f32 %v518_v62 }
 0x2ec   :  { %v954_v33 = vpop.eup %953 }
 0x2ed   :  { %v956_v34 = vpop.eup %955  ;;  %885 = vst [vmem:[%s1520_s3 + $0x10] sm:$0xff] %v954_v33  ;;  %v529_v36 = vpack.c.bf16 %v954_v33, %v954_v33 }
 0x2ee   :  { %886 = vst [vmem:[%s1521_s4 + $0x28] sm:$0xff] %v956_v34  ;;  %v530_v35 = vpack.c.bf16 %v956_v34, %v956_v34 }
 0x2f0   :  { %563 = vmatprep.mubr.bf16.mxu1 %v530_v35 }
 0x2f1   :  { %564 = vmatmul.mubr.bf16.vlgmr.msra.gmra.mrb[4].mxu1 %v529_v36 }
 0x2f2   :  { %642 = vmatpush1.bf16.msra.mxu1 %v1011_v1 }
 0x2f3   :  { %643 = vmatprep.subr.bf16.mxu1 %v1018_v3 }
 0x2f6   :  { %644 = vmatpush1.bf16.msra.mxu1 %v1025_v4 }
 0x2f7   :  { %645 = vmatprep.subr.bf16.mxu1 %v1032_v5 }
 0x2fa   :  { %646 = vmatpush1.bf16.msra.mxu1 %v1039_v6 }
 0x2fb   :  { %647 = vmatprep.subr.bf16.mxu1 %v1046_v7 }
 0x2fe   :  { %648 = vmatpush1.bf16.msra.mxu1 %v1053_v8 }
 0x2ff   :  { %649 = vmatprep.subr.bf16.mxu1 %v1060_v9 }
 0x302   :  { %650 = vmatpush1.bf16.msra.mxu1 %v1067_v10 }
 0x303   :  { %651 = vmatprep.subr.bf16.mxu1 %v1074_v11 }
 0x306   :  { %652 = vmatpush1.bf16.msra.mxu1 %v1081_v12 }
 0x307   :  { %653 = vmatprep.subr.bf16.mxu1 %v1088_v13 }
 0x30a   :  { %654 = vmatpush1.bf16.msra.mxu1 %v1095_v14 }
 0x30b   :  { %655 = vmatprep.subr.bf16.mxu1 %v1102_v15 }
 0x30e   :  { %656 = vmatpush1.bf16.msra.mxu1 %v1109_v16 }
 0x30f   :  { %657 = vmatprep.subr.bf16.mxu1 %v1116_v17 }
 0x312   :  { %658 = vmatpush1.bf16.msra.mxu1 %v1123_v18 }
 0x313   :  { %659 = vmatprep.subr.bf16.mxu1 %v1130_v19 }
 0x316   :  { %660 = vmatpush1.bf16.msra.mxu1 %v1137_v20 }
 0x317   :  { %661 = vmatprep.subr.bf16.mxu1 %v1144_v21 }
 0x31a   :  { %662 = vmatpush1.bf16.msra.mxu1 %v1151_v22 }
 0x31b   :  { %663 = vmatprep.subr.bf16.mxu1 %v1158_v23 }
 0x31e   :  { %664 = vmatpush1.bf16.msra.mxu1 %v1165_v24 }
 0x31f   :  { %665 = vmatprep.subr.bf16.mxu1 %v1172_v25 }
 0x322   :  { %666 = vmatpush1.bf16.msra.mxu1 %v1179_v26 }
 0x323   :  { %667 = vmatprep.subr.bf16.mxu1 %v1186_v27 }
 0x326   :  { %668 = vmatpush1.bf16.msra.mxu1 %v1193_v28 }
 0x327   :  { %669 = vmatprep.subr.bf16.mxu1 %v1200_v29 }
 0x32a   :  { %670 = vmatpush1.bf16.msra.mxu1 %v1207_v30 }
 0x32b   :  { %671 = vmatprep.subr.bf16.mxu1 %v1214_v31 }
 0x32e   :  { %672 = vmatpush1.bf16.msra.mxu1 %v1221_v32 }
 0x32f   :  { %750 = vmatprep.subr.bf16.mxu1 %v1006_v0 }
 0x3c4   :  { %v565_v39 = vpop.f32.mrb[4].mxu1 }
 0x3c5   :  { %v572_v40 = vadd.f32 %v565_v39, %v59_v37  ;;  %v567_v41 = vpop.f32.mrb[5].mxu1 }
 0x3c6   :  { %v573_v42 = vadd.f32 %v846_v38, %v567_v41  ;;  %v569_v43 = vpop.f32.mrb[6].mxu1 }
 0x3c7   :  { %957 = vtanh.f32 %v572_v40  ;;  %v570_v44 = vpop.f32.mrb[7].mxu1 }
 0x3c8   :  { %959 = vtanh.f32 %v573_v42 }
 0x3d1   :  { %v958_v45 = vpop.eup %957 }
 0x3d2   :  { %v960_v46 = vpop.eup %959  ;;  %887 = vst [vmem:[%s1520_s3 + $0x18] sm:$0xff] %v958_v45  ;;  %v584_v47 = vpack.c.bf16 %v958_v45, %v958_v45 }
 0x3d3   :  { %888 = vst [vmem:[%s1521_s4 + $0x20] sm:$0xff] %v960_v46  ;;  %v585_v0 = vpack.c.bf16 %v960_v46, %v960_v46 }
 0x3d5   :  { %618 = vmatprep.mubr.bf16.mxu0 %v585_v0 }
 0x3d6   :  { %619 = vmatmul.mubr.bf16.vlgmr.msra.gmra.mrb[8].mxu0 %v584_v47 }
 0x3d7   :  { %697 = vmatpush1.bf16.msra.mxu0 %v1011_v1 }
 0x3d8   :  { %698 = vmatprep.subr.bf16.mxu0 %v1018_v3 }
 0x3db   :  { %699 = vmatpush1.bf16.msra.mxu0 %v1025_v4 }
 0x3dc   :  { %700 = vmatprep.subr.bf16.mxu0 %v1032_v5 }
 0x3df   :  { %701 = vmatpush1.bf16.msra.mxu0 %v1039_v6 }
 0x3e0   :  { %702 = vmatprep.subr.bf16.mxu0 %v1046_v7 }
 0x3e3   :  { %703 = vmatpush1.bf16.msra.mxu0 %v1053_v8 }
 0x3e4   :  { %704 = vmatprep.subr.bf16.mxu0 %v1060_v9 }
 0x3e7   :  { %705 = vmatpush1.bf16.msra.mxu0 %v1067_v10 }
 0x3e8   :  { %706 = vmatprep.subr.bf16.mxu0 %v1074_v11 }
 0x3eb   :  { %707 = vmatpush1.bf16.msra.mxu0 %v1081_v12 }
 0x3ec   :  { %708 = vmatprep.subr.bf16.mxu0 %v1088_v13 }
 0x3ef   :  { %709 = vmatpush1.bf16.msra.mxu0 %v1095_v14 }
 0x3f0   :  { %710 = vmatprep.subr.bf16.mxu0 %v1102_v15 }
 0x3f3   :  { %711 = vmatpush1.bf16.msra.mxu0 %v1109_v16 }
 0x3f4   :  { %712 = vmatprep.subr.bf16.mxu0 %v1116_v17 }
 0x3f7   :  { %713 = vmatpush1.bf16.msra.mxu0 %v1123_v18 }
 0x3f8   :  { %714 = vmatprep.subr.bf16.mxu0 %v1130_v19 }
 0x3fb   :  { %715 = vmatpush1.bf16.msra.mxu0 %v1137_v20 }
 0x3fc   :  { %716 = vmatprep.subr.bf16.mxu0 %v1144_v21 }
 0x3ff   :  { %717 = vmatpush1.bf16.msra.mxu0 %v1151_v22 }
 0x400   :  { %718 = vmatprep.subr.bf16.mxu0 %v1158_v23 }
 0x403   :  { %719 = vmatpush1.bf16.msra.mxu0 %v1165_v24 }
 0x404   :  { %720 = vmatprep.subr.bf16.mxu0 %v1172_v25 }
 0x407   :  { %721 = vmatpush1.bf16.msra.mxu0 %v1179_v26 }
 0x408   :  { %722 = vmatprep.subr.bf16.mxu0 %v1186_v27 }
 0x40b   :  { %723 = vmatpush1.bf16.msra.mxu0 %v1193_v28 }
 0x40c   :  { %724 = vmatprep.subr.bf16.mxu0 %v1200_v29 }
 0x40f   :  { %725 = vmatpush1.bf16.msra.mxu0 %v1207_v30 }
 0x410   :  { %726 = vmatprep.subr.bf16.mxu0 %v1214_v31 }
 0x413   :  { %727 = vmatpush1.bf16.msra.mxu0 %v1221_v32 }
 0x4a9   :  { %v620_v50 = vpop.f32.mrb[8].mxu0 }
 0x4aa   :  { %v627_v51 = vadd.f32 %v620_v50, %v61_v48  ;;  %v622_v52 = vpop.f32.mrb[9].mxu0 }
 0x4ab   :  { %v628_v53 = vadd.f32 %v845_v49, %v622_v52  ;;  %v624_v54 = vpop.f32.mrb[10].mxu0 }
 0x4ac   :  { %961 = vtanh.f32 %v627_v51  ;;  %v625_v55 = vpop.f32.mrb[11].mxu0 }
 0x4ad   :  { %963 = vtanh.f32 %v628_v53 }
 0x4b6   :  { %v962_v56 = vpop.eup %961 }
 0x4b7   :  { %v964_v57 = vpop.eup %963  ;;  %889 = vst [vmem:[%s1520_s3 + $0x20] sm:$0xff] %v962_v56  ;;  %v639_v59 = vpack.c.bf16 %v962_v56, %v962_v56 }
 0x4b8   :  { %890 = vst [vmem:[%s1521_s4 + $0x18] sm:$0xff] %v964_v57  ;;  %v640_v58 = vpack.c.bf16 %v964_v57, %v964_v57 }
 0x4ba   :  { %673 = vmatprep.mubr.bf16.mxu1 %v640_v58 }
 0x4bb   :  { %674 = vmatmul.mubr.bf16.vlgmr.msra.gmra.mrb[8].mxu1 %v639_v59 }
 0x4bc   :  { %751 = vmatpush1.bf16.msra.mxu1 %v1011_v1  ;;  %v63_v1 = vld [vmem:[%s1517_s0 + $0x50] sm:$0xff] }
 0x4bd   :  { %752 = vmatprep.subr.bf16.mxu1 %v1018_v3  ;;  %v844_v3 = vld [vmem:[%s1518_s1 + $0x28] sm:$0xff] }
 0x4c0   :  { %753 = vmatpush1.bf16.msra.mxu1 %v1025_v4 }
 0x4c1   :  { %754 = vmatprep.subr.bf16.mxu1 %v1032_v5 }
 0x4c4   :  { %755 = vmatpush1.bf16.msra.mxu1 %v1039_v6 }
 0x4c5   :  { %756 = vmatprep.subr.bf16.mxu1 %v1046_v7 }
 0x4c8   :  { %757 = vmatpush1.bf16.msra.mxu1 %v1053_v8 }
 0x4c9   :  { %758 = vmatprep.subr.bf16.mxu1 %v1060_v9 }
 0x4cc   :  { %759 = vmatpush1.bf16.msra.mxu1 %v1067_v10 }
 0x4cd   :  { %760 = vmatprep.subr.bf16.mxu1 %v1074_v11 }
 0x4d0   :  { %761 = vmatpush1.bf16.msra.mxu1 %v1081_v12 }
 0x4d1   :  { %762 = vmatprep.subr.bf16.mxu1 %v1088_v13 }
 0x4d4   :  { %763 = vmatpush1.bf16.msra.mxu1 %v1095_v14  ;;  %v65_v14 = vld [vmem:[%s1517_s0 + $0x60] sm:$0xff] }
 0x4d5   :  { %764 = vmatprep.subr.bf16.mxu1 %v1102_v15  ;;  %v843_v15 = vld [vmem:[%s1518_s1 + $0x18] sm:$0xff] }
 0x4d8   :  { %765 = vmatpush1.bf16.msra.mxu1 %v1109_v16 }
 0x4d9   :  { %766 = vmatprep.subr.bf16.mxu1 %v1116_v17 }
 0x4dc   :  { %767 = vmatpush1.bf16.msra.mxu1 %v1123_v18 }
 0x4dd   :  { %768 = vmatprep.subr.bf16.mxu1 %v1130_v19 }
 0x4e0   :  { %769 = vmatpush1.bf16.msra.mxu1 %v1137_v20 }
 0x4e1   :  { %770 = vmatprep.subr.bf16.mxu1 %v1144_v21 }
 0x4e4   :  { %771 = vmatpush1.bf16.msra.mxu1 %v1151_v22 }
 0x4e5   :  { %772 = vmatprep.subr.bf16.mxu1 %v1158_v23 }
 0x4e8   :  { %773 = vmatpush1.bf16.msra.mxu1 %v1165_v24 }
 0x4e9   :  { %774 = vmatprep.subr.bf16.mxu1 %v1172_v25 }
 0x4ec   :  { %775 = vmatpush1.bf16.msra.mxu1 %v1179_v26  ;;  %v67_v26 = vld [vmem:[%s1517_s0 + $0x70] sm:$0xff] }
 0x4ed   :  { %776 = vmatprep.subr.bf16.mxu1 %v1186_v27  ;;  %v842_v27 = vld [vmem:[%s1518_s1 + $0x8] sm:$0xff] }
 0x4f0   :  { %777 = vmatpush1.bf16.msra.mxu1 %v1193_v28 }
 0x4f1   :  { %778 = vmatprep.subr.bf16.mxu1 %v1200_v29 }
 0x4f4   :  { %779 = vmatpush1.bf16.msra.mxu1 %v1207_v30 }
 0x4f5   :  { %780 = vmatprep.subr.bf16.mxu1 %v1214_v31 }
 0x4f8   :  { %781 = vmatpush1.bf16.msra.mxu1 %v1221_v32 }
 0x58e   :  { %v675_v4 = vpop.f32.mrb[8].mxu1 }
 0x58f   :  { %v682_v5 = vadd.f32 %v675_v4, %v63_v1  ;;  %v677_v6 = vpop.f32.mrb[9].mxu1 }
 0x590   :  { %v683_v7 = vadd.f32 %v844_v3, %v677_v6  ;;  %v679_v8 = vpop.f32.mrb[10].mxu1 }
 0x591   :  { %965 = vtanh.f32 %v682_v5  ;;  %v680_v9 = vpop.f32.mrb[11].mxu1 }
 0x592   :  { %967 = vtanh.f32 %v683_v7 }
 0x59b   :  { %v966_v10 = vpop.eup %965 }
 0x59c   :  { %v968_v11 = vpop.eup %967  ;;  %891 = vst [vmem:[%s1520_s3 + $0x28] sm:$0xff] %v966_v10  ;;  %v694_v13 = vpack.c.bf16 %v966_v10, %v966_v10 }
 0x59d   :  { %892 = vst [vmem:[%s1521_s4 + $0x10] sm:$0xff] %v968_v11  ;;  %v695_v12 = vpack.c.bf16 %v968_v11, %v968_v11 }
 0x59f   :  { %728 = vmatprep.mubr.bf16.mxu0 %v695_v12 }
 0x5a0   :  { %729 = vmatmul.mubr.bf16.vlgmr.msra.gmra.mrb[12].mxu0 %v694_v13 }
 0x673   :  { %v730_v16 = vpop.f32.mrb[12].mxu0 }
 0x674   :  { %v737_v17 = vadd.f32 %v730_v16, %v65_v14  ;;  %v732_v18 = vpop.f32.mrb[13].mxu0 }
 0x675   :  { %v738_v19 = vadd.f32 %v843_v15, %v732_v18  ;;  %v734_v20 = vpop.f32.mrb[14].mxu0 }
 0x676   :  { %969 = vtanh.f32 %v737_v17  ;;  %v735_v21 = vpop.f32.mrb[15].mxu0 }
 0x677   :  { %971 = vtanh.f32 %v738_v19 }
 0x680   :  { %v970_v22 = vpop.eup %969 }
 0x681   :  { %v972_v23 = vpop.eup %971  ;;  %893 = vst [vmem:[%s1520_s3 + $0x30] sm:$0xff] %v970_v22  ;;  %v748_v25 = vpack.c.bf16 %v970_v22, %v970_v22 }
 0x682   :  { %894 = vst [vmem:[%s1521_s4 + $0x8] sm:$0xff] %v972_v23  ;;  %v749_v24 = vpack.c.bf16 %v972_v23, %v972_v23 }
 0x684   :  { %782 = vmatprep.mubr.bf16.mxu1 %v749_v24 }
 0x685   :  { %783 = vmatmul.mubr.bf16.vlgmr.msra.gmra.mrb[12].mxu1 %v748_v25 }
 0x758   :  { %v784_v28 = vpop.f32.mrb[12].mxu1 }
 0x759   :  { %v791_v29 = vadd.f32 %v784_v28, %v67_v26  ;;  %v786_v30 = vpop.f32.mrb[13].mxu1 }
 0x75a   :  { %v792_v31 = vadd.f32 %v842_v27, %v786_v30  ;;  %v788_v32 = vpop.f32.mrb[14].mxu1 }
 0x75b   :  { %973 = vtanh.f32 %v791_v29  ;;  %v789_v60 = vpop.f32.mrb[15].mxu1 }
 0x75c   :  { %975 = vtanh.f32 %v792_v31 }
 0x765   :  { %v974_v61 = vpop.eup %973 }
 0x766   :  { %v976_v62 = vpop.eup %975  ;;  %895 = vst [vmem:[%s1520_s3 + $0x38] sm:$0xff] %v974_v61 }
 0x767   :  { %797 = vst [vmem:[%s1521_s4] sm:$0xff] %v976_v62 }

</bundles_post_ra>
